<compile_context>
chip_gen: v7x
topology: tpu7x:2x2x1
jax: 0.10.0
libtpu: 0.0.40
codegen_flags: <defaults>
</compile_context>

<pallas_src>
import jax
import jax.numpy as jnp
import numpy as np
from jax.experimental import pallas as pl
from jax.experimental.pallas import tpu as pltpu

IN_F, H1, H2, OUT_F = 12, 512, 256, 1


def mlp_kernel(x_ref, w1_ref, b1_ref, w2_ref, b2_ref, w3_ref, b3_ref, o_ref):
    # Transposed dataflow: everything is (features, batch); batch on lanes.
    x = x_ref[...]                                                      # (12, T) bf16

    # layer_1 + ReLU  (BN1 already folded into w2/b2; dropout = identity in eval)
    h1 = jnp.dot(w1_ref[...], x, preferred_element_type=jnp.float32)   # (512, T) f32
    h1 = jnp.maximum(h1 + b1_ref[...], 0.0).astype(jnp.bfloat16)       # (512, T) bf16

    # layer_2 + ReLU  (BN2 already folded into w3/b3; dropout = identity in eval)
    h2 = jnp.dot(w2_ref[...], h1, preferred_element_type=jnp.float32)  # (256, T) f32
    h2 = jnp.maximum(h2 + b2_ref[...], 0.0).astype(jnp.bfloat16)       # (256, T) bf16

    # layer_out: (1,256) @ (256,T) -> lane-dense (1, T) output block
    out = jnp.dot(w3_ref[...], h2, preferred_element_type=jnp.float32)
    o_ref[...] = out + b3_ref[...]                                      # (1, T) f32


def mlp_forward(x, kernel_params, tile=1024):
    """x: (N, 12) f32.  Returns (N, 1) f32."""
    w1, b1, w2, b2, w3, b3 = kernel_params
    n = x.shape[0]

    # Batch rides the lane axis -> tile must be a multiple of 128.
    n_lane = ((n + 127) // 128) * 128
    n_steps = max(1, pl.cdiv(n_lane, tile))
    if n_steps == 1 and n_lane >= 256:
        n_steps = 2          # give the v7x megacore >=2 steps to shard
    t = ((pl.cdiv(n_lane, n_steps) + 127) // 128) * 128
    n_pad = n_steps * t

    # Pre-cast + transpose + pad once in the wrapper: (N,12) f32 -> (12, n_pad) bf16.
    xt = jnp.pad(x.astype(jnp.bfloat16).T, ((0, 0), (0, n_pad - n)))

    resident = lambda i: (0, 0)   # weights/biases: DMA once, stay VMEM-resident

    out = pl.pallas_call(
        mlp_kernel,
        out_shape=jax.ShapeDtypeStruct((OUT_F, n_pad), jnp.float32),
        grid=(n_steps,),
        in_specs=[
            pl.BlockSpec((IN_F, t), lambda i: (0, i)),   # x tile (12, T), lane-dense
            pl.BlockSpec((H1, IN_F), resident),          # w1 bf16 (512, 12)
            pl.BlockSpec((H1, 1), resident),             # b1 f32  (512, 1)
            pl.BlockSpec((H2, H1), resident),            # w2 bf16 (256, 512), BN1-folded
            pl.BlockSpec((H2, 1), resident),             # b2 f32  (256, 1),   BN1-folded
            pl.BlockSpec((OUT_F, H2), resident),         # w3 bf16 (1, 256),   BN2-folded
            pl.BlockSpec((OUT_F, 1), resident),          # b3 f32  (1, 1),     BN2-folded
        ],
        out_specs=pl.BlockSpec((OUT_F, t), lambda i: (0, i)),
        compiler_params=pltpu.CompilerParams(
            dimension_semantics=("parallel",)),
    )(xt, w1, b1, w2, b2, w3, b3)

    return out[:, :n].T      # back to (N, 1); padded columns sliced off


def make_params(key):
    """Deterministic init matching the PyTorch module __init__ (fresh BN stats).

    Returns (kernel_params, raw_params):
      kernel_params: transposed-layout (out,in) weights, BN folded into the
                     following linear, weights cast to bf16, biases as columns.
      raw_params:    unfused f32 params for the pure-JAX reference.
    """
    ks = jax.random.split(key, 6)
    eps = 1e-5

    def linear(kw, kb, fan_in, fan_out):
        bound = 1.0 / np.sqrt(fan_in)
        w = jax.random.uniform(kw, (fan_out, fan_in), jnp.float32, -bound, bound)
        b = jax.random.uniform(kb, (fan_out,), jnp.float32, -bound, bound)
        return w, b

    w1, b1 = linear(ks[0], ks[1], IN_F, H1)
    w2, b2 = linear(ks[2], ks[3], H1, H2)
    w3, b3 = linear(ks[4], ks[5], H2, OUT_F)

    # BatchNorm1d fresh init: gamma=1, beta=0, running_mean=0, running_var=1.
    # Eval-mode affine: scale = gamma/sqrt(var+eps), shift = beta - mean*scale.
    def bn_affine(num_features):
        gamma = jnp.ones((num_features,), jnp.float32)
        beta = jnp.zeros((num_features,), jnp.float32)
        mean = jnp.zeros((num_features,), jnp.float32)
        var = jnp.ones((num_features,), jnp.float32)
        scale = gamma / jnp.sqrt(var + eps)
        shift = beta - mean * scale
        return scale, shift

    s1, t1 = bn_affine(H1)
    s2, t2 = bn_affine(H2)
    raw = (w1, b1, s1, t1, w2, b2, s2, t2, w3, b3)

    # Fold eval-mode BN into the NEXT linear (weights in (out,in) layout):
    #   W_next @ (s*h + t) + b == (W_next * s[None,:]) @ h + (W_next @ t + b)
    w2f = w2 * s1[None, :]
    b2f = w2 @ t1 + b2
    w3f = w3 * s2[None, :]
    b3f = w3 @ t2 + b3

    kernel_params = (
        w1.astype(jnp.bfloat16), b1.reshape(H1, 1),
        w2f.astype(jnp.bfloat16), b2f.reshape(H2, 1),
        w3f.astype(jnp.bfloat16), b3f.reshape(OUT_F, 1),
    )
    return kernel_params, raw


def reference_forward(x, raw_params):
    """Pure-JAX f32 eval-mode reference (unfused BN, no dropout)."""
    (w1, b1, s1, t1, w2, b2, s2, t2, w3, b3) = raw_params
    h1 = jnp.maximum(x @ w1.T + b1, 0.0) * s1 + t1
    h2 = jnp.maximum(h1 @ w2.T + b2, 0.0) * s2 + t2
    return h2 @ w3.T + b3


if __name__ == "__main__":
    key = jax.random.PRNGKey(0)
    k_x, k_p = jax.random.split(key)
    kernel_params, raw_params = make_params(k_p)

    # Small primary case + a ragged multi-tile case (exercises padding / grid>1).
    for batch in (8, 300):
        kx = jax.random.fold_in(k_x, batch)
        x = jax.random.normal(kx, (batch, IN_F), jnp.float32)

        out = jax.block_until_ready(mlp_forward(x, kernel_params))
        ref = reference_forward(x, raw_params)
        # bf16 matmul operands with f32 accumulation -> relaxed tolerance vs f32 reference.
        np.testing.assert_allclose(np.asarray(out), np.asarray(ref),
                                   rtol=2e-2, atol=2e-2)

    print("KERNEL_OK")
</pallas_src>

<mosaic_0001>
module attributes {stable_mosaic.version = 11 : i64} {
  func.func @mlp_kernel(%arg0: i32, %arg1: memref<12x128xbf16, #tpu.memory_space<vmem>>, %arg2: memref<512x12xbf16, #tpu.memory_space<vmem>>, %arg3: memref<512x1xf32, #tpu.memory_space<vmem>>, %arg4: memref<256x512xbf16, #tpu.memory_space<vmem>>, %arg5: memref<256x1xf32, #tpu.memory_space<vmem>>, %arg6: memref<1x256xbf16, #tpu.memory_space<vmem>>, %arg7: memref<1x1xf32, #tpu.memory_space<vmem>>, %arg8: memref<1x128xf32, #tpu.memory_space<vmem>>) attributes {dimension_semantics = [#tpu.dimension_semantics<parallel>], iteration_bounds = array<i64: 1>, scalar_prefetch = 0 : i64, scratch_operands = 0 : i64, tpu.core_type = #tpu.core_type<tc>, window_params = [{transform_indices = @transform_0, window_bounds = array<i64: 12, 128>}, {pipeline_mode = #tpu.pipeline_mode<synchronous>, transform_indices = @transform_1, window_bounds = array<i64: 512, 12>}, {pipeline_mode = #tpu.pipeline_mode<synchronous>, transform_indices = @transform_2, window_bounds = array<i64: 512, 1>}, {pipeline_mode = #tpu.pipeline_mode<synchronous>, transform_indices = @transform_3, window_bounds = array<i64: 256, 512>}, {pipeline_mode = #tpu.pipeline_mode<synchronous>, transform_indices = @transform_4, window_bounds = array<i64: 256, 1>}, {pipeline_mode = #tpu.pipeline_mode<synchronous>, transform_indices = @transform_5, window_bounds = array<i64: 1, 256>}, {pipeline_mode = #tpu.pipeline_mode<synchronous>, transform_indices = @transform_6, window_bounds = array<i64: 1, 1>}, {transform_indices = @transform_7, window_bounds = array<i64: 1, 128>}]} {
    %c0 = arith.constant 0 : index
    %c0_0 = arith.constant 0 : index
    %0 = vector.load %arg1[%c0, %c0_0] : memref<12x128xbf16, #tpu.memory_space<vmem>>, vector<12x128xbf16>
    %c0_1 = arith.constant 0 : index
    %c0_2 = arith.constant 0 : index
    %1 = vector.load %arg2[%c0_1, %c0_2] : memref<512x12xbf16, #tpu.memory_space<vmem>>, vector<512x12xbf16>
    %cst = arith.constant dense<0.000000e+00> : vector<512x128xf32>
    %2 = tpu.matmul %1, %0, %cst {dimension_numbers = #tpu.dot_dimension_numbers<[1], [0], [0], [1], [0, 0, 1, 1], [], []>} : vector<512x12xbf16>, vector<12x128xbf16>, vector<512x128xf32> -> vector<512x128xf32>
    %c0_3 = arith.constant 0 : index
    %c0_4 = arith.constant 0 : index
    %3 = vector.load %arg3[%c0_3, %c0_4] : memref<512x1xf32, #tpu.memory_space<vmem>>, vector<512x1xf32>
    %4 = vector.broadcast %3 : vector<512x1xf32> to vector<512x128xf32>
    %5 = arith.addf %2, %4 : vector<512x128xf32>
    %cst_5 = arith.constant 0.000000e+00 : f32
    %6 = vector.broadcast %cst_5 : f32 to vector<512x128xf32>
    %7 = arith.maximumf %5, %6 : vector<512x128xf32>
    %8 = arith.truncf %7 : vector<512x128xf32> to vector<512x128xbf16>
    %c0_6 = arith.constant 0 : index
    %c0_7 = arith.constant 0 : index
    %9 = vector.load %arg4[%c0_6, %c0_7] : memref<256x512xbf16, #tpu.memory_space<vmem>>, vector<256x512xbf16>
    %cst_8 = arith.constant dense<0.000000e+00> : vector<256x128xf32>
    %10 = tpu.matmul %9, %8, %cst_8 {dimension_numbers = #tpu.dot_dimension_numbers<[1], [0], [0], [1], [0, 0, 1, 1], [], []>} : vector<256x512xbf16>, vector<512x128xbf16>, vector<256x128xf32> -> vector<256x128xf32>
    %c0_9 = arith.constant 0 : index
    %c0_10 = arith.constant 0 : index
    %11 = vector.load %arg5[%c0_9, %c0_10] : memref<256x1xf32, #tpu.memory_space<vmem>>, vector<256x1xf32>
    %12 = vector.broadcast %11 : vector<256x1xf32> to vector<256x128xf32>
    %13 = arith.addf %10, %12 : vector<256x128xf32>
    %cst_11 = arith.constant 0.000000e+00 : f32
    %14 = vector.broadcast %cst_11 : f32 to vector<256x128xf32>
    %15 = arith.maximumf %13, %14 : vector<256x128xf32>
    %16 = arith.truncf %15 : vector<256x128xf32> to vector<256x128xbf16>
    %c0_12 = arith.constant 0 : index
    %c0_13 = arith.constant 0 : index
    %17 = vector.load %arg6[%c0_12, %c0_13] : memref<1x256xbf16, #tpu.memory_space<vmem>>, vector<1x256xbf16>
    %cst_14 = arith.constant dense<0.000000e+00> : vector<1x128xf32>
    %18 = tpu.matmul %17, %16, %cst_14 {dimension_numbers = #tpu.dot_dimension_numbers<[1], [0], [0], [1], [0, 0, 1, 1], [], []>} : vector<1x256xbf16>, vector<256x128xbf16>, vector<1x128xf32> -> vector<1x128xf32>
    %c0_15 = arith.constant 0 : index
    %c0_16 = arith.constant 0 : index
    %19 = vector.load %arg7[%c0_15, %c0_16] : memref<1x1xf32, #tpu.memory_space<vmem>>, vector<1x1xf32>
    %20 = vector.broadcast %19 : vector<1x1xf32> to vector<1x128xf32>
    %21 = arith.addf %18, %20 : vector<1x128xf32>
    %c0_17 = arith.constant 0 : index
    %c0_18 = arith.constant 0 : index
    %22 = vector.load %arg8[%c0_17, %c0_18] : memref<1x128xf32, #tpu.memory_space<vmem>>, vector<1x128xf32>
    tpu.vector_store %arg8[%c0_17, %c0_18], %21 {strides = array<i32>} : memref<1x128xf32, #tpu.memory_space<vmem>>, vector<1x128xf32>,
    return
  }
  func.func @transform_0(%arg0: i32) -> (i32, i32) {
    %c0_i32 = arith.constant 0 : i32
    %c0_i32_0 = arith.constant 0 : i32
    return %c0_i32, %arg0 : i32, i32
  }
  func.func @transform_1(%arg0: i32) -> (i32, i32) {
    %c0_i32 = arith.constant 0 : i32
    %c0_i32_0 = arith.constant 0 : i32
    %c0_i32_1 = arith.constant 0 : i32
    return %c0_i32, %c0_i32_0 : i32, i32
  }
  func.func @transform_2(%arg0: i32) -> (i32, i32) {
    %c0_i32 = arith.constant 0 : i32
    %c0_i32_0 = arith.constant 0 : i32
    %c0_i32_1 = arith.constant 0 : i32
    return %c0_i32, %c0_i32_0 : i32, i32
  }
  func.func @transform_3(%arg0: i32) -> (i32, i32) {
    %c0_i32 = arith.constant 0 : i32
    %c0_i32_0 = arith.constant 0 : i32
    %c0_i32_1 = arith.constant 0 : i32
    return %c0_i32, %c0_i32_0 : i32, i32
  }
  func.func @transform_4(%arg0: i32) -> (i32, i32) {
    %c0_i32 = arith.constant 0 : i32
    %c0_i32_0 = arith.constant 0 : i32
    %c0_i32_1 = arith.constant 0 : i32
    return %c0_i32, %c0_i32_0 : i32, i32
  }
  func.func @transform_5(%arg0: i32) -> (i32, i32) {
    %c0_i32 = arith.constant 0 : i32
    %c0_i32_0 = arith.constant 0 : i32
    %c0_i32_1 = arith.constant 0 : i32
    return %c0_i32, %c0_i32_0 : i32, i32
  }
  func.func @transform_6(%arg0: i32) -> (i32, i32) {
    %c0_i32 = arith.constant 0 : i32
    %c0_i32_0 = arith.constant 0 : i32
    %c0_i32_1 = arith.constant 0 : i32
    return %c0_i32, %c0_i32_0 : i32, i32
  }
  func.func @transform_7(%arg0: i32) -> (i32, i32) {
    %c0_i32 = arith.constant 0 : i32
    %c0_i32_0 = arith.constant 0 : i32
    return %c0_i32, %arg0 : i32, i32
  }
}

</mosaic_0001>

<bundles_post_ra>
// kernel: tpu_custom_call.1
= control target key start
LH: loop header
LB: loop body
LE: loop exit
PB: predicated region body
PF: predicated region fallthrough
CT: control target
= control target key end

     0   :  { %s3877_s0 = inlined_call_operand.vmem [shape: bf16[12,128], index: 0, kind: input, shape index: {}]   ;;  %s3878_s1 = inlined_call_operand.vmem [shape: bf16[512,12], index: 1, kind: input, shape index: {}]   ;;  %s3879_s2 = inlined_call_operand.vmem [shape: f32[512,1], index: 2, kind: input, shape index: {}]   ;;  %s3880_s3 = inlined_call_operand.vmem [shape: bf16[256,512], index: 3, kind: input, shape index: {}]   ;;  %s3881_s4 = inlined_call_operand.vmem [shape: f32[256,1], index: 4, kind: input, shape index: {}]   ;;  %s3882_s5 = inlined_call_operand.vmem [shape: bf16[1,256], index: 5, kind: input, shape index: {}]   ;;  %s3883_s6 = inlined_call_operand.<no memory space> [shape: f32[1,1], index: 6, kind: input, shape index: {}]   ;;  %s3884_s7 = inlined_call_operand.hbm [shape: f32[1,128], index: 7, kind: output, shape index: {}]  }
   0x1   :  { %v12_v0 = vstv %s3883_s6 }
   0x2   :  { %13 = vst [vmem:[#allocation2] sm:$0x1] %v12_v0 }
   0x3   :  { %v112_v1 = vld [vmem:[%s3879_s2 + $0x80] sm:$0xff]  ;;  %vm742_vm0 = vcmask 1045504   ;;  %v2805_v3 = vmov 0   ;;  %v113_v5 = vld [vmem:[%s3879_s2 + $0x88] sm:$0xff]  ;;  %vm645_vm1 = vcmask 97280   ;;  %v2654_v9 = vld [vmem:[%s3878_s1 + $0x90] sm:$0xff]  }
   0x4   :  { %v96_v2 = vld [vmem:[%s3879_s2] sm:$0xff]  ;;  %2651 = vset.pattern.permute.xlu1 %v2805_v3  ;;  %2650 = vset.pattern.permute.xlu0 %v2805_v3  ;;  %v97_v6 = vld [vmem:[%s3879_s2 + $0x8] sm:$0xff]  ;;  %v2656_v11 = vld [vmem:[%s3878_s1 + $0x98] sm:$0xff]  }
   0x5   :  { %v2652_v4 = vld [vmem:[%s3877_s0] sm:$0x3f]   ;;  %242 = vperm.xlu0 %2650, %v112_v1   ;;  %162 = vperm.xlu1 %2651, %v96_v2   ;;  %v2655_v10 = vld [vmem:[%s3878_s1 + $0x8] sm:$0xff]   ;;  %v2657_v14 = vld [vmem:[%s3878_s1 + $0x10] sm:$0xff]  }
   0x6   :  { %2645 = vmatprep.subr.msk.bf16.mxu0 %vm742_vm0, %v2652_v4  ;;  %2646 = vmatprep.subr.msk.bf16.mxu1 %vm742_vm0, %v2652_v4  ;;  %v744_v7 = vsel %vm742_vm0, %v2652_v4, 0  ;;  %v2653_v8 = vld [vmem:[%s3878_s1] sm:$0xff]   ;;  %v145_v13 = vld [vmem:[%s3879_s2 + $0x188] sm:$0xff]  ;;  %v2659_v18 = vld [vmem:[%s3878_s1 + $0x18] sm:$0xff]  }
   0x7   :  { %2578 = vmatpush3.bf16.msra.mxu0 %v744_v7  ;;  %2644 = vmatpush3.bf16.msra.mxu1 %v744_v7  ;;  %v144_v12 = vld [vmem:[%s3879_s2 + $0x180] sm:$0xff]  ;;  %v129_v17 = vld [vmem:[%s3879_s2 + $0x108] sm:$0xff]  ;;  %v114_v20 = vld [vmem:[%s3879_s2 + $0x90] sm:$0xff] }
   0x8   :  { %2579 = vmatprep.mubr.msk.bf16.mxu0 %vm645_vm1, %v2653_v8  ;;  %2615 = vmatprep.mubr.msk.bf16.mxu1 %vm645_vm1, %v2654_v9  ;;  %v2658_v15 = vld [vmem:[%s3878_s1 + $0xa0] sm:$0xff]   ;;  %v2660_v19 = vld [vmem:[%s3878_s1 + $0xa8] sm:$0xff]   ;;  %v2662_v22 = vld [vmem:[%s3878_s1 + $0xb0] sm:$0xff]  }
   0x9   :  { %247 = vperm.xlu0 %2650, %v113_v5   ;;  %167 = vperm.xlu1 %2651, %v97_v6   ;;  %v128_v16 = vld [vmem:[%s3879_s2 + $0x100] sm:$0xff]  ;;  %v115_v23 = vld [vmem:[%s3879_s2 + $0x98] sm:$0xff]  ;;  %v98_v24 = vld [vmem:[%s3879_s2 + $0x10] sm:$0xff] }
   0xa   :  { %2580 = vmatmul.mubr.msk.bf16.vlgmr.msra.gmra.mrb[0].mxu0 %vm645_vm1, %v2655_v10  ;;  %2616 = vmatmul.mubr.msk.bf16.vlgmr.msra.gmra.mrb[0].mxu1 %vm645_vm1, %v2656_v11  ;;  %v2661_v21 = vld [vmem:[%s3878_s1 + $0x20] sm:$0xff]   ;;  %v99_v25 = vld [vmem:[%s3879_s2 + $0x18] sm:$0xff]  ;;  %v2663_v26 = vld [vmem:[%s3878_s1 + $0x28] sm:$0xff]  }
   0xb   :  { %2583 = vmatprep.mubr.msk.bf16.mxu0 %vm645_vm1, %v2657_v14  ;;  %2619 = vmatprep.mubr.msk.bf16.mxu1 %vm645_vm1, %v2658_v15  ;;  %v2664_v27 = vld [vmem:[%s3878_s1 + $0xb8] sm:$0xff]   ;;  %v2665_v28 = vld [vmem:[%s3878_s1 + $0x30] sm:$0xff]   ;;  %v2666_v29 = vld [vmem:[%s3878_s1 + $0xc0] sm:$0xff]  }
   0xc   :  { %v146_v30 = vld [vmem:[%s3879_s2 + $0x190] sm:$0xff]  ;;  %v147_v31 = vld [vmem:[%s3879_s2 + $0x198] sm:$0xff]  ;;  %v2668_v35 = vld [vmem:[%s3878_s1 + $0xc8] sm:$0xff]  }
   0xd   :  { %402 = vperm.xlu0 %2650, %v144_v12   ;;  %407 = vperm.xlu1 %2651, %v145_v13   ;;  %v130_v32 = vld [vmem:[%s3879_s2 + $0x110] sm:$0xff]  ;;  %v131_v33 = vld [vmem:[%s3879_s2 + $0x118] sm:$0xff]  ;;  %v2669_v36 = vld [vmem:[%s3878_s1 + $0x40] sm:$0xff]  }
   0xe   :  { %v2667_v34 = vld [vmem:[%s3878_s1 + $0x38] sm:$0xff]   ;;  %v2670_v37 = vld [vmem:[%s3878_s1 + $0xd0] sm:$0xff]   ;;  %v116_v38 = vld [vmem:[%s3879_s2 + $0xa0] sm:$0xff] }
   0xf   :  { %v117_v39 = vld [vmem:[%s3879_s2 + $0xa8] sm:$0xff]  ;;  %v100_v40 = vld [vmem:[%s3879_s2 + $0x20] sm:$0xff]  ;;  %v2672_v43 = vld [vmem:[%s3878_s1 + $0xd8] sm:$0xff]  }
  0x10   :  { %v101_v41 = vld [vmem:[%s3879_s2 + $0x28] sm:$0xff]  ;;  %v2673_v44 = vld [vmem:[%s3878_s1 + $0x50] sm:$0xff]   ;;  %v2674_v45 = vld [vmem:[%s3878_s1 + $0xe0] sm:$0xff]  }
  0x11   :  { %322 = vperm.xlu0 %2650, %v128_v16   ;;  %327 = vperm.xlu1 %2651, %v129_v17   ;;  %v2671_v42 = vld [vmem:[%s3878_s1 + $0x48] sm:$0xff]   ;;  %v148_v46 = vld [vmem:[%s3879_s2 + $0x1a0] sm:$0xff]  ;;  %v2675_v50 = vld [vmem:[%s3878_s1 + $0x58] sm:$0xff]  }
  0x12   :  { %2584 = vmatmul.mubr.msk.bf16.gmra.mrb[4].mxu0 %vm645_vm1, %v2659_v18  ;;  %2620 = vmatmul.mubr.msk.bf16.gmra.mrb[4].mxu1 %vm645_vm1, %v2660_v19  ;;  %v149_v47 = vld [vmem:[%s3879_s2 + $0x1a8] sm:$0xff]  ;;  %v132_v48 = vld [vmem:[%s3879_s2 + $0x120] sm:$0xff]  ;;  %v2678_v53 = vld [vmem:[%s3878_s1 + $0xf0] sm:$0xff]  }
  0x13   :  { %2587 = vmatprep.mubr.msk.bf16.mxu0 %vm645_vm1, %v2661_v21  ;;  %2623 = vmatprep.mubr.msk.bf16.mxu1 %vm645_vm1, %v2662_v22  ;;  %v133_v49 = vld [vmem:[%s3879_s2 + $0x128] sm:$0xff]  ;;  %v2677_v52 = vld [vmem:[%s3878_s1 + $0x60] sm:$0xff]   ;;  %v118_v54 = vld [vmem:[%s3879_s2 + $0xb0] sm:$0xff] }
  0x14   :  { %v2676_v51 = vld [vmem:[%s3878_s1 + $0xe8] sm:$0xff]   ;;  %v119_v55 = vld [vmem:[%s3879_s2 + $0xb8] sm:$0xff]  ;;  %v102_v56 = vld [vmem:[%s3879_s2 + $0x30] sm:$0xff] }
  0x15   :  { %252 = vperm.xlu0 %2650, %v114_v20   ;;  %257 = vperm.xlu1 %2651, %v115_v23   ;;  %v103_v57 = vld [vmem:[%s3879_s2 + $0x38] sm:$0xff]  ;;  %v2679_v58 = vld [vmem:[%s3878_s1 + $0x68] sm:$0xff]   ;;  %v2681_v60 = vld [vmem:[%s3878_s1 + $0x70] sm:$0xff]  }
  0x16   :  { %v2680_v59 = vld [vmem:[%s3878_s1 + $0xf8] sm:$0xff]   ;;  %v150_v61 = vld [vmem:[%s3879_s2 + $0x1b0] sm:$0xff]  ;;  %v2683_v2 = vld [vmem:[%s3878_s1 + $0x80] sm:$0xff]  }
  0x17   :  { %v151_v62 = vld [vmem:[%s3879_s2 + $0x1b8] sm:$0xff]  ;;  %v134_v63 = vld [vmem:[%s3879_s2 + $0x130] sm:$0xff]  ;;  %v120_v3 = vld [vmem:[%s3879_s2 + $0xc0] sm:$0xff] }
  0x18   :  { %v135_v0 = vld [vmem:[%s3879_s2 + $0x138] sm:$0xff]  ;;  %v121_v4 = vld [vmem:[%s3879_s2 + $0xc8] sm:$0xff]  ;;  %v104_v5 = vld [vmem:[%s3879_s2 + $0x40] sm:$0xff] }
  0x19   :  { %172 = vperm.xlu0 %2650, %v98_v24   ;;  %177 = vperm.xlu1 %2651, %v99_v25   ;;  %v2682_v1 = vld [vmem:[%s3878_s1 + $0x78] sm:$0xff]   ;;  %v105_v6 = vld [vmem:[%s3879_s2 + $0x48] sm:$0xff]  ;;  %v152_v8 = vld [vmem:[%s3879_s2 + $0x1c0] sm:$0xff] }
  0x1a   :  { %2588 = vmatmul.mubr.msk.bf16.gmra.mrb[8].mxu0 %vm645_vm1, %v2663_v26  ;;  %2624 = vmatmul.mubr.msk.bf16.gmra.mrb[8].mxu1 %vm645_vm1, %v2664_v27  ;;  %v2684_v7 = vld [vmem:[%s3878_s1 + $0x88] sm:$0xff]   ;;  %v136_v10 = vld [vmem:[%s3879_s2 + $0x140] sm:$0xff]  ;;  %v122_v12 = vld [vmem:[%s3879_s2 + $0xd0] sm:$0xff] }
  0x1b   :  { %2591 = vmatprep.mubr.msk.bf16.mxu0 %vm645_vm1, %v2665_v28  ;;  %2627 = vmatprep.mubr.msk.bf16.mxu1 %vm645_vm1, %v2666_v29  ;;  %v153_v9 = vld [vmem:[%s3879_s2 + $0x1c8] sm:$0xff]  ;;  %v123_v13 = vld [vmem:[%s3879_s2 + $0xd8] sm:$0xff]  ;;  %v106_v14 = vld [vmem:[%s3879_s2 + $0x50] sm:$0xff] }
  0x1c   :  { %v137_v11 = vld [vmem:[%s3879_s2 + $0x148] sm:$0xff]  ;;  %v107_v15 = vld [vmem:[%s3879_s2 + $0x58] sm:$0xff] }
  0x1d   :  { %412 = vperm.xlu0 %2650, %v146_v30   ;;  %417 = vperm.xlu1 %2651, %v147_v31  }
  0x21   :  { %332 = vperm.xlu0 %2650, %v130_v32   ;;  %337 = vperm.xlu1 %2651, %v131_v33  }
  0x22   :  { %2592 = vmatmul.mubr.msk.bf16.gmra.mrb[12].mxu0 %vm645_vm1, %v2667_v34  ;;  %2628 = vmatmul.mubr.msk.bf16.gmra.mrb[12].mxu1 %vm645_vm1, %v2668_v35 }
  0x23   :  { %2595 = vmatprep.mubr.msk.bf16.mxu0 %vm645_vm1, %v2669_v36  ;;  %2631 = vmatprep.mubr.msk.bf16.mxu1 %vm645_vm1, %v2670_v37 }
  0x25   :  { %262 = vperm.xlu0 %2650, %v116_v38   ;;  %267 = vperm.xlu1 %2651, %v117_v39  }
  0x29   :  { %182 = vperm.xlu0 %2650, %v100_v40   ;;  %187 = vperm.xlu1 %2651, %v101_v41  }
  0x2a   :  { %2596 = vmatmul.mubr.msk.bf16.gmra.mrb[16].mxu0 %vm645_vm1, %v2671_v42  ;;  %2632 = vmatmul.mubr.msk.bf16.gmra.mrb[16].mxu1 %vm645_vm1, %v2672_v43 }
  0x2b   :  { %2599 = vmatprep.mubr.msk.bf16.mxu0 %vm645_vm1, %v2673_v44  ;;  %2635 = vmatprep.mubr.msk.bf16.mxu1 %vm645_vm1, %v2674_v45 }
  0x2d   :  { %422 = vperm.xlu0 %2650, %v148_v46   ;;  %427 = vperm.xlu1 %2651, %v149_v47  }
  0x31   :  { %342 = vperm.xlu0 %2650, %v132_v48   ;;  %347 = vperm.xlu1 %2651, %v133_v49  }
  0x32   :  { %2600 = vmatmul.mubr.msk.bf16.gmra.mrb[20].mxu0 %vm645_vm1, %v2675_v50  ;;  %2636 = vmatmul.mubr.msk.bf16.gmra.mrb[20].mxu1 %vm645_vm1, %v2676_v51 }
  0x33   :  { %2603 = vmatprep.mubr.msk.bf16.mxu0 %vm645_vm1, %v2677_v52  ;;  %2639 = vmatprep.mubr.msk.bf16.mxu1 %vm645_vm1, %v2678_v53 }
  0x35   :  { %272 = vperm.xlu0 %2650, %v118_v54   ;;  %277 = vperm.xlu1 %2651, %v119_v55  }
  0x39   :  { %192 = vperm.xlu0 %2650, %v102_v56   ;;  %197 = vperm.xlu1 %2651, %v103_v57  }
  0x3a   :  { %2604 = vmatmul.mubr.msk.bf16.gmra.mrb[24].mxu0 %vm645_vm1, %v2679_v58  ;;  %2640 = vmatmul.mubr.msk.bf16.gmra.mrb[24].mxu1 %vm645_vm1, %v2680_v59 }
  0x3b   :  { %2607 = vmatprep.mubr.msk.bf16.mxu0 %vm645_vm1, %v2681_v60 }
  0x3d   :  { %432 = vperm.xlu0 %2650, %v150_v61   ;;  %437 = vperm.xlu1 %2651, %v151_v62  }
  0x41   :  { %352 = vperm.xlu0 %2650, %v134_v63   ;;  %357 = vperm.xlu1 %2651, %v135_v0  }
  0x42   :  { %2608 = vmatmul.mubr.msk.bf16.gmra.mrb[28].mxu0 %vm645_vm1, %v2682_v1 }
  0x43   :  { %2611 = vmatprep.mubr.msk.bf16.mxu0 %vm645_vm1, %v2683_v2 }
  0x45   :  { %282 = vperm.xlu0 %2650, %v120_v3   ;;  %287 = vperm.xlu1 %2651, %v121_v4  }
  0x49   :  { %202 = vperm.xlu0 %2650, %v104_v5   ;;  %207 = vperm.xlu1 %2651, %v105_v6  }
  0x4a   :  { %2612 = vmatmul.mubr.msk.bf16.gmra.mrb[32].mxu0 %vm645_vm1, %v2684_v7 }
  0x4d   :  { %442 = vperm.xlu0 %2650, %v152_v8   ;;  %447 = vperm.xlu1 %2651, %v153_v9  }
  0x51   :  { %362 = vperm.xlu0 %2650, %v136_v10   ;;  %367 = vperm.xlu1 %2651, %v137_v11  }
  0x55   :  { %292 = vperm.xlu0 %2650, %v122_v12   ;;  %297 = vperm.xlu1 %2651, %v123_v13  }
  0x59   :  { %212 = vperm.xlu0 %2650, %v106_v14   ;;  %217 = vperm.xlu1 %2651, %v107_v15  }
  0x5a   :  { %14 = vsyncpa [#allocation4], 0  ;;  %v154_v16 = vld [vmem:[%s3879_s2 + $0x1d0] sm:$0xff]  ;;  %v155_v17 = vld [vmem:[%s3879_s2 + $0x1d8] sm:$0xff] }
  0x5b   :  { %v138_v18 = vld [vmem:[%s3879_s2 + $0x150] sm:$0xff]  ;;  %v139_v19 = vld [vmem:[%s3879_s2 + $0x158] sm:$0xff]  ;;  %v124_v20 = vld [vmem:[%s3879_s2 + $0xe0] sm:$0xff] }
  0x5c   :  { %v125_v21 = vld [vmem:[%s3879_s2 + $0xe8] sm:$0xff]  ;;  %v108_v22 = vld [vmem:[%s3879_s2 + $0x60] sm:$0xff]  ;;  %v126_v28 = vld [vmem:[%s3879_s2 + $0xf0] sm:$0xff] }
  0x5d   :  { %452 = vperm.xlu0 %2650, %v154_v16   ;;  %457 = vperm.xlu1 %2651, %v155_v17   ;;  %v109_v23 = vld [vmem:[%s3879_s2 + $0x68] sm:$0xff]  ;;  %v156_v24 = vld [vmem:[%s3879_s2 + $0x1e0] sm:$0xff]  ;;  %v127_v29 = vld [vmem:[%s3879_s2 + $0xf8] sm:$0xff] }
  0x5e   :  { %v157_v25 = vld [vmem:[%s3879_s2 + $0x1e8] sm:$0xff]  ;;  %v140_v26 = vld [vmem:[%s3879_s2 + $0x160] sm:$0xff]  ;;  %v110_v30 = vld [vmem:[%s3879_s2 + $0x70] sm:$0xff] }
  0x5f   :  { %v141_v27 = vld [vmem:[%s3879_s2 + $0x168] sm:$0xff]  ;;  %v111_v31 = vld [vmem:[%s3879_s2 + $0x78] sm:$0xff]  ;;  %v158_v32 = vld [vmem:[%s3879_s2 + $0x1f0] sm:$0xff] }
  0x60   :  { %v159_v33 = vld [vmem:[%s3879_s2 + $0x1f8] sm:$0xff]  ;;  %v142_v34 = vld [vmem:[%s3879_s2 + $0x170] sm:$0xff]  ;;  %v1211_v36 = vld [vmem:[%s3881_s4 + $0x80] sm:$0xff] }
  0x61   :  { %372 = vperm.xlu0 %2650, %v138_v18   ;;  %377 = vperm.xlu1 %2651, %v139_v19   ;;  %v143_v35 = vld [vmem:[%s3879_s2 + $0x178] sm:$0xff]  ;;  %v1212_v37 = vld [vmem:[%s3881_s4 + $0x88] sm:$0xff]  ;;  %v1195_v40 = vld [vmem:[%s3881_s4] sm:$0xff] }
  0x62   :  { %v1196_v41 = vld [vmem:[%s3881_s4 + $0x8] sm:$0xff]  ;;  %v1213_v44 = vld [vmem:[%s3881_s4 + $0x90] sm:$0xff]  ;;  %v1214_v45 = vld [vmem:[%s3881_s4 + $0x98] sm:$0xff] }
  0x63   :  { %v1197_v48 = vld [vmem:[%s3881_s4 + $0x10] sm:$0xff]  ;;  %v1198_v49 = vld [vmem:[%s3881_s4 + $0x18] sm:$0xff]  ;;  %v1215_v52 = vld [vmem:[%s3881_s4 + $0xa0] sm:$0xff] }
  0x64   :  { %v1216_v53 = vld [vmem:[%s3881_s4 + $0xa8] sm:$0xff]  ;;  %v1199_v56 = vld [vmem:[%s3881_s4 + $0x20] sm:$0xff]  ;;  %v1217_v60 = vld [vmem:[%s3881_s4 + $0xb0] sm:$0xff] }
  0x65   :  { %302 = vperm.xlu0 %2650, %v124_v20   ;;  %307 = vperm.xlu1 %2651, %v125_v21   ;;  %v1200_v57 = vld [vmem:[%s3881_s4 + $0x28] sm:$0xff]  ;;  %v1218_v61 = vld [vmem:[%s3881_s4 + $0xb8] sm:$0xff]  ;;  %v1201_v0 = vld [vmem:[%s3881_s4 + $0x30] sm:$0xff] }
  0x66   :  { %v1202_v1 = vld [vmem:[%s3881_s4 + $0x38] sm:$0xff]  ;;  %v1219_v4 = vld [vmem:[%s3881_s4 + $0xc0] sm:$0xff]  ;;  %v1220_v5 = vld [vmem:[%s3881_s4 + $0xc8] sm:$0xff] }
  0x67   :  { %v2687_v8 = vld [vmem:[%s3880_s3 + $0x4] ss:$16 sps:$4 sm:$0xff]   ;;  %v1204_v10 = vld [vmem:[%s3881_s4 + $0x48] sm:$0xff]  ;;  %v1222_v14 = vld [vmem:[%s3881_s4 + $0xd8] sm:$0xff] }
  0x68   :  { %v1203_v9 = vld [vmem:[%s3881_s4 + $0x40] sm:$0xff]  ;;  %1739 = vmatprep.mubr.bf16.mxu1 %v2687_v8  ;;  %v1221_v13 = vld [vmem:[%s3881_s4 + $0xd0] sm:$0xff]  ;;  %v1206_v18 = vld [vmem:[%s3881_s4 + $0x58] sm:$0xff] }
  0x69   :  { %222 = vperm.xlu0 %2650, %v108_v22   ;;  %227 = vperm.xlu1 %2651, %v109_v23   ;;  %v1205_v17 = vld [vmem:[%s3881_s4 + $0x50] sm:$0xff]  ;;  %v1223_v21 = vld [vmem:[%s3881_s4 + $0xe0] sm:$0xff]  ;;  %v1224_v22 = vld [vmem:[%s3881_s4 + $0xe8] sm:$0xff] }
  0x6d   :  { %462 = vperm.xlu0 %2650, %v156_v24   ;;  %467 = vperm.xlu1 %2651, %v157_v25   ;;  %v1207_v25 = vld [vmem:[%s3881_s4 + $0x60] sm:$0xff] }
  0x71   :  { %382 = vperm.xlu0 %2650, %v140_v26   ;;  %387 = vperm.xlu1 %2651, %v141_v27   ;;  %v1208_v26 = vld [vmem:[%s3881_s4 + $0x68] sm:$0xff] }
  0x75   :  { %312 = vperm.xlu0 %2650, %v126_v28   ;;  %317 = vperm.xlu1 %2651, %v127_v29   ;;  %v1225_v29 = vld [vmem:[%s3881_s4 + $0xf0] sm:$0xff] }
  0x79   :  { %232 = vperm.xlu0 %2650, %v110_v30   ;;  %237 = vperm.xlu1 %2651, %v111_v31   ;;  %v1226_v30 = vld [vmem:[%s3881_s4 + $0xf8] sm:$0xff] }
  0x7d   :  { %472 = vperm.xlu0 %2650, %v158_v32   ;;  %477 = vperm.xlu1 %2651, %v159_v33   ;;  %v1209_v33 = vld [vmem:[%s3881_s4 + $0x70] sm:$0xff] }
  0x81   :  { %392 = vperm.xlu0 %2650, %v142_v34   ;;  %397 = vperm.xlu1 %2651, %v143_v35   ;;  %v1210_v34 = vld [vmem:[%s3881_s4 + $0x78] sm:$0xff] }
  0x84   :  { %v3180_v38 = vpop.permute.xlu0 %242  ;;  %v3182_v39 = vpop.permute.xlu1 %162 }
  0x85   :  { %1309 = vperm.xlu0 %2650, %v1211_v36   ;;  %1314 = vperm.xlu1 %2651, %v1212_v37   ;;  %v2078_v37 = vld [vmem:[#allocation2] sm:$0x1] }
  0x88   :  { %v3190_v42 = vpop.permute.xlu0 %247  ;;  %v3192_v43 = vpop.permute.xlu1 %167 }
  0x89   :  { %1229 = vperm.xlu0 %2650, %v1195_v40   ;;  %1234 = vperm.xlu1 %2651, %v1196_v41  }
  0x8c   :  { %v3200_v46 = vpop.permute.xlu0 %402  ;;  %v3202_v47 = vpop.permute.xlu1 %407 }
  0x8d   :  { %1319 = vperm.xlu0 %2650, %v1213_v44   ;;  %1324 = vperm.xlu1 %2651, %v1214_v45   ;;  %v2699_v44 = vld [vmem:[%s3880_s3 + $0xc] ss:$16 sps:$4 sm:$0xff]  }
  0x8e   :  { %1900 = vmatprep.mubr.bf16.mxu0 %v2699_v44 }
  0x90   :  { %v3210_v50 = vpop.permute.xlu0 %322  ;;  %v3212_v51 = vpop.permute.xlu1 %327 }
  0x91   :  { %3885 = vst [vmem:[#allocation6_spill] sm:$0xff] %v3212_v51  ;;  %1239 = vperm.xlu0 %2650, %v1197_v48   ;;  %1244 = vperm.xlu1 %2651, %v1198_v49  }
  0x94   :  { %v3220_v54 = vpop.permute.xlu0 %252  ;;  %v3222_v55 = vpop.permute.xlu1 %257 }
  0x95   :  { %1329 = vperm.xlu0 %2650, %v1215_v52   ;;  %1334 = vperm.xlu1 %2651, %v1216_v53  }
  0x98   :  { %v3230_v58 = vpop.permute.xlu0 %172  ;;  %v3232_v59 = vpop.permute.xlu1 %177 }
  0x99   :  { %1249 = vperm.xlu0 %2650, %v1199_v56   ;;  %1254 = vperm.xlu1 %2651, %v1200_v57  }
  0x9c   :  { %v3240_v62 = vpop.permute.xlu0 %412  ;;  %v3242_v63 = vpop.permute.xlu1 %417 }
  0x9d   :  { %1339 = vperm.xlu0 %2650, %v1217_v60   ;;  %1344 = vperm.xlu1 %2651, %v1218_v61  }
  0xa0   :  { %v3250_v2 = vpop.permute.xlu0 %332  ;;  %v3252_v3 = vpop.permute.xlu1 %337 }
  0xa1   :  { %3886 = vst [vmem:[#allocation7_spill] sm:$0xff] %v3252_v3  ;;  %1259 = vperm.xlu0 %2650, %v1201_v0   ;;  %1264 = vperm.xlu1 %2651, %v1202_v1  }
  0xa4   :  { %v3260_v6 = vpop.permute.xlu0 %262  ;;  %v3262_v7 = vpop.permute.xlu1 %267 }
  0xa5   :  { %1349 = vperm.xlu0 %2650, %v1219_v4   ;;  %1354 = vperm.xlu1 %2651, %v1220_v5  }
  0xa8   :  { %v3273_v11 = vpop.permute.xlu0 %182  ;;  %v3275_v12 = vpop.permute.xlu1 %187 }
  0xa9   :  { %1269 = vperm.xlu0 %2650, %v1203_v9   ;;  %1274 = vperm.xlu1 %2651, %v1204_v10  }
  0xac   :  { %v3283_v15 = vpop.permute.xlu0 %422  ;;  %v3285_v16 = vpop.permute.xlu1 %427 }
  0xad   :  { %1359 = vperm.xlu0 %2650, %v1221_v13   ;;  %1364 = vperm.xlu1 %2651, %v1222_v14  }
  0xb0   :  { %v343_v19 = vpop.permute.xlu0 %342  ;;  %v3293_v20 = vpop.permute.xlu1 %347 }
  0xb1   :  { %1279 = vperm.xlu0 %2650, %v1205_v17   ;;  %1284 = vperm.xlu1 %2651, %v1206_v18  }
  0xb4   :  { %v3301_v23 = vpop.permute.xlu0 %272  ;;  %v3303_v24 = vpop.permute.xlu1 %277 }
  0xb5   :  { %1369 = vperm.xlu0 %2650, %v1223_v21   ;;  %1374 = vperm.xlu1 %2651, %v1224_v22  }
  0xb8   :  { %v3311_v27 = vpop.permute.xlu0 %192  ;;  %v3313_v28 = vpop.permute.xlu1 %197 }
  0xb9   :  { %1289 = vperm.xlu0 %2650, %v1207_v25   ;;  %1294 = vperm.xlu1 %2651, %v1208_v26  }
  0xbc   :  { %v3321_v31 = vpop.permute.xlu0 %432  ;;  %v3323_v32 = vpop.permute.xlu1 %437 }
  0xbd   :  { %1379 = vperm.xlu0 %2650, %v1225_v29   ;;  %1384 = vperm.xlu1 %2651, %v1226_v30  }
  0xc0   :  { %v353_v35 = vpop.permute.xlu0 %352  ;;  %v358_v36 = vpop.permute.xlu1 %357 }
  0xc1   :  { %1299 = vperm.xlu0 %2650, %v1209_v33   ;;  %1304 = vperm.xlu1 %2651, %v1210_v34  }
  0xc4   :  { %v3331_v40 = vpop.permute.xlu0 %282  ;;  %v3333_v41 = vpop.permute.xlu1 %287 }
  0xc5   :  { %2081 = vperm.xlu0 %2650, %v2078_v37  }
  0xc8   :  { %v3338_v45 = vpop.permute.xlu0 %202  ;;  %v3340_v48 = vpop.permute.xlu1 %207 }
  0xcc   :  { %v3342_v49 = vpop.permute.xlu0 %442  ;;  %v3344_v52 = vpop.permute.xlu1 %447 }
  0xd0   :  { %v363_v53 = vpop.permute.xlu0 %362  ;;  %v368_v56 = vpop.permute.xlu1 %367 }
  0xd4   :  { %v3346_v57 = vpop.permute.xlu0 %292  ;;  %v3348_v60 = vpop.permute.xlu1 %297 }
  0xd8   :  { %v3350_v61 = vpop.permute.xlu0 %212  ;;  %v3352_v0 = vpop.permute.xlu1 %217 }
  0xdc   :  { %v3354_v1 = vpop.permute.xlu0 %452  ;;  %v3356_v4 = vpop.permute.xlu1 %457 }
  0xdd   :  { %v2581_v5 = vpop.f32.mrb[0].mxu0  ;;  %v2617_v9 = vpop.f32.mrb[0].mxu1 }
  0xde   :  { %v789_v8 = vadd.f32 %v2581_v5, %v3230_v58  ;;  %v780_v10 = vpop.f32.mrb[1].mxu0  ;;  %v933_v13 = vadd.f32 %v2617_v9, %v353_v35  ;;  %v924_v14 = vpop.f32.mrb[1].mxu1 }
  0xdf   :  { %v2582_v17 = vpop.f32.mrb[2].mxu0  ;;  %v781_v18 = vadd.f32 %v780_v10, %v3182_v39  ;;  %v925_v21 = vadd.f32 %v924_v14, %v343_v19  ;;  %v2618_v25 = vpop.f32.mrb[2].mxu1 }
  0xe0   :  { %v792_v22 = vadd.f32 %v2582_v17, %v3232_v59  ;;  %v373_v26 = vpop.permute.xlu0 %372  ;;  %v936_v29 = vadd.f32 %v2618_v25, %v358_v36  ;;  %v378_v30 = vpop.permute.xlu1 %377  ;;  %v1037_v34 = vmax.f32 %v789_v8, 0.0  ;;  %v1073_v5 = vmax.f32 %v933_v13, 0.0 }
  0xe1   :  { %v783_v33 = vpop.f32.mrb[3].mxu0  ;;  %v927_v58 = vpop.f32.mrb[3].mxu1  ;;  %v1035_v9 = vmax.f32 %v781_v18, 0.0  ;;  %v1071_v59 = vmax.f32 %v925_v21, 0.0 }
  0xe2   :  { %v1038_v37 = vmax.f32 %v792_v22, 0.0  ;;  %v784_v44 = vadd.f32 %v783_v33, %v3192_v43  ;;  %v1074_v51 = vmax.f32 %v936_v29, 0.0  ;;  %v928_v35 = vadd.f32 %v927_v58, %v3293_v20 }
  0xe4   :  { %v3363_v3 = vpack.c.bf16 %v1038_v37, %v1037_v34  ;;  %v1036_v39 = vmax.f32 %v784_v44, 0.0  ;;  %v3365_v19 = vpop.permute.xlu0 %302  ;;  %v3367_v10 = vpack.c.bf16 %v1074_v51, %v1073_v5  ;;  %v1072_v36 = vmax.f32 %v928_v35, 0.0  ;;  %v3369_v14 = vpop.permute.xlu1 %307 }
  0xe5   :  { %v2585_v8 = vpop.f32.mrb[4].mxu0  ;;  %v2621_v13 = vpop.f32.mrb[4].mxu1 }
  0xe6   :  { %3887 = vst [vmem:[#allocation8_spill] sm:$0xff] %v3367_v10  ;;  %v3371_v17 = vpack.c.bf16 %v1036_v39, %v1035_v9  ;;  %v805_v43 = vadd.f32 %v2585_v8, %v3311_v27  ;;  %v796_v22 = vpop.f32.mrb[5].mxu0  ;;  %v3374_v20 = vpack.c.bf16 %v1072_v36, %v1071_v59  ;;  %v949_v18 = vadd.f32 %v2621_v13, %v373_v26  ;;  %v940_v25 = vpop.f32.mrb[5].mxu1 }
  0xe7   :  { %v2586_v29 = vpop.f32.mrb[6].mxu0  ;;  %v797_v33 = vadd.f32 %v796_v22, %v3273_v11  ;;  %v2622_v21 = vpop.f32.mrb[6].mxu1  ;;  %v941_v37 = vadd.f32 %v940_v25, %v363_v53 }
  0xe8   :  { %3888 = vst [vmem:[#allocation9_spill] sm:$0xff] %v3374_v20  ;;  %v808_v51 = vadd.f32 %v2586_v29, %v3313_v28  ;;  %v223_v34 = vpop.permute.xlu0 %222  ;;  %v952_v44 = vadd.f32 %v2622_v21, %v378_v30  ;;  %v228_v58 = vpop.permute.xlu1 %227  ;;  %v1041_v35 = vmax.f32 %v805_v43, 0.0  ;;  %v1077_v59 = vmax.f32 %v949_v18, 0.0 }
  0xe9   :  { %v799_v5 = vpop.f32.mrb[7].mxu0  ;;  %v943_v39 = vpop.f32.mrb[7].mxu1  ;;  %v1039_v8 = vmax.f32 %v797_v33, 0.0  ;;  %v1075_v28 = vmax.f32 %v941_v37, 0.0 }
  0xea   :  { %v1042_v9 = vmax.f32 %v808_v51, 0.0  ;;  %v800_v27 = vadd.f32 %v799_v5, %v3275_v12  ;;  %v1078_v36 = vmax.f32 %v952_v44, 0.0  ;;  %v944_v26 = vadd.f32 %v943_v39, %v368_v56 }
  0xec   :  { %v3379_v13 = vpack.c.bf16 %v1042_v9, %v1041_v35  ;;  %v1040_v11 = vmax.f32 %v800_v27, 0.0  ;;  %v3381_v22 = vpop.permute.xlu0 %462  ;;  %v3383_v29 = vpack.c.bf16 %v1078_v36, %v1077_v59  ;;  %v1076_v53 = vmax.f32 %v944_v26, 0.0  ;;  %v3385_v30 = vpop.permute.xlu1 %467 }
  0xed   :  { %v2589_v43 = vpop.f32.mrb[8].mxu0  ;;  %v3390_v18 = vpop.f32.mrb[8].mxu1 }
  0xee   :  { %3889 = vst [vmem:[#allocation10_spill] sm:$0xff] %v3383_v29  ;;  %v3387_v25 = vpack.c.bf16 %v1040_v11, %v1039_v8  ;;  %v821_v12 = vadd.f32 %v2589_v43, %v3350_v61  ;;  %v812_v56 = vpop.f32.mrb[9].mxu0  ;;  %v3392_v33 = vpack.c.bf16 %v1076_v53, %v1075_v28  ;;  %v956_v51 = vpop.f32.mrb[9].mxu1 }
  0xef   :  { %v2590_v21 = vpop.f32.mrb[10].mxu0  ;;  %v813_v44 = vadd.f32 %v812_v56, %v3338_v45  ;;  %v3396_v5 = vpop.f32.mrb[10].mxu1 }
  0xf0   :  { %3890 = vst [vmem:[#allocation11_spill] sm:$0xff] %v3392_v33  ;;  %v824_v37 = vadd.f32 %v2590_v21, %v3352_v0  ;;  %v383_v35 = vpop.permute.xlu0 %382  ;;  %v388_v27 = vpop.permute.xlu1 %387  ;;  %v1045_v59 = vmax.f32 %v821_v12, 0.0 }
  0xf1   :  { %v957_v9 = vadd.f32 %v956_v51, %v383_v35  ;;  %v815_v39 = vpop.f32.mrb[11].mxu0  ;;  %v959_v26 = vpop.f32.mrb[11].mxu1  ;;  %v1043_v28 = vmax.f32 %v813_v44, 0.0 }
  0xf2   :  { %v1046_v36 = vmax.f32 %v824_v37, 0.0  ;;  %v816_v61 = vadd.f32 %v815_v39, %v3340_v48  ;;  %v960_v11 = vadd.f32 %v959_v26, %v388_v27 }
  0xf3   :  { %v1079_v8 = vmax.f32 %v957_v9, 0.0 }
  0xf4   :  { %v3399_v53 = vpack.c.bf16 %v1046_v36, %v1045_v59  ;;  %v1044_v43 = vmax.f32 %v816_v61, 0.0  ;;  %v3401_v45 = vpop.permute.xlu0 %312  ;;  %v1080_v0 = vmax.f32 %v960_v11, 0.0  ;;  %v3403_v56 = vpop.permute.xlu1 %317 }
  0xf5   :  { %v2593_v21 = vpop.f32.mrb[12].mxu0  ;;  %v2629_v35 = vpop.f32.mrb[12].mxu1 }
  0xf6   :  { %v3405_v51 = vpack.c.bf16 %v1044_v43, %v1043_v28  ;;  %v828_v12 = vpop.f32.mrb[13].mxu0  ;;  %v3407_v37 = vpack.c.bf16 %v1080_v0, %v1079_v8  ;;  %v981_v48 = vadd.f32 %v2629_v35, %v3240_v62  ;;  %v972_v9 = vpop.f32.mrb[13].mxu1 }
  0xf7   :  { %v2594_v27 = vpop.f32.mrb[14].mxu0  ;;  %v829_v44 = vadd.f32 %v828_v12, %v223_v34  ;;  %v2630_v39 = vpop.f32.mrb[14].mxu1  ;;  %v973_v36 = vadd.f32 %v972_v9, %v3200_v46 }
  0xf8   :  { %3891 = vst [vmem:[#allocation12_spill] sm:$0xff] %v3407_v37  ;;  %v233_v59 = vpop.permute.xlu0 %232  ;;  %v984_v61 = vadd.f32 %v2630_v39, %v3242_v63  ;;  %v238_v11 = vpop.permute.xlu1 %237  ;;  %v1085_v10 = vmax.f32 %v981_v48, 0.0 }
  0xf9   :  { %v837_v26 = vadd.f32 %v2593_v21, %v233_v59  ;;  %v831_v29 = vpop.f32.mrb[15].mxu0  ;;  %v840_v28 = vadd.f32 %v2594_v27, %v238_v11  ;;  %v975_v33 = vpop.f32.mrb[15].mxu1  ;;  %v1047_v35 = vmax.f32 %v829_v44, 0.0  ;;  %v1083_v20 = vmax.f32 %v973_v36, 0.0 }
  0xfa   :  { %v832_v43 = vadd.f32 %v831_v29, %v228_v58  ;;  %v1086_v8 = vmax.f32 %v984_v61, 0.0  ;;  %v976_v62 = vadd.f32 %v975_v33, %v3202_v47 }
  0xfb   :  { %v1049_v0 = vmax.f32 %v837_v26, 0.0  ;;  %v1050_v37 = vmax.f32 %v840_v28, 0.0 }
  0xfc   :  { %v1048_v34 = vmax.f32 %v832_v43, 0.0  ;;  %v3413_v12 = vpop.permute.xlu0 %472  ;;  %v3415_v46 = vpack.c.bf16 %v1086_v8, %v1085_v10  ;;  %v1084_v63 = vmax.f32 %v976_v62, 0.0  ;;  %v3417_v21 = vpop.permute.xlu1 %477 }
  0xfd   :  { %v2597_v9 = vpop.f32.mrb[16].mxu0  ;;  %v3419_v27 = vpack.c.bf16 %v1050_v37, %v1049_v0  ;;  %v2633_v48 = vpop.f32.mrb[16].mxu1 }
  0xfe   :  { %v3421_v58 = vpack.c.bf16 %v1048_v34, %v1047_v35  ;;  %v853_v29 = vadd.f32 %v2597_v9, %v3220_v54  ;;  %v844_v47 = vpop.f32.mrb[17].mxu0  ;;  %v1123_v33 = vpack.c.bf16 %v1084_v63, %v1083_v20  ;;  %v997_v44 = vadd.f32 %v2633_v48, %v3321_v31  ;;  %v988_v39 = vpop.f32.mrb[17].mxu1 }
  0xff   :  { %v2598_v59 = vpop.f32.mrb[18].mxu0  ;;  %v845_v10 = vadd.f32 %v844_v47, %v3180_v38  ;;  %v2634_v61 = vpop.f32.mrb[18].mxu1  ;;  %v989_v37 = vadd.f32 %v988_v39, %v3283_v15 }
 0x100   :  { %v856_v36 = vadd.f32 %v2598_v59, %v3222_v55  ;;  %v393_v26 = vpop.permute.xlu0 %392  ;;  %v1000_v11 = vadd.f32 %v2634_v61, %v3323_v32  ;;  %2443 = vmatprep.subr.bf16.mxu0 %v1123_v33  ;;  %v398_v28 = vpop.permute.xlu1 %397  ;;  %v1053_v20 = vmax.f32 %v853_v29, 0.0  ;;  %v1089_v62 = vmax.f32 %v997_v44, 0.0 }
 0x101   :  { %v965_v54 = vadd.f32 %v3390_v18, %v393_v26  ;;  %v847_v43 = vpop.f32.mrb[19].mxu0  ;;  %v968_v31 = vadd.f32 %v3396_v5, %v398_v28  ;;  %v991_v38 = vpop.f32.mrb[19].mxu1  ;;  %v1051_v15 = vmax.f32 %v845_v10, 0.0  ;;  %v1087_v48 = vmax.f32 %v989_v37, 0.0 }
 0x102   :  { %v1054_v8 = vmax.f32 %v856_v36, 0.0  ;;  %v848_v0 = vadd.f32 %v847_v43, %v3190_v42  ;;  %v1090_v55 = vmax.f32 %v1000_v11, 0.0  ;;  %v992_v34 = vadd.f32 %v991_v38, %v3285_v16 }
 0x103   :  { %v1081_v35 = vmax.f32 %v965_v54, 0.0  ;;  %v1082_v32 = vmax.f32 %v968_v31, 0.0 }
 0x104   :  { %v1108_v63 = vpack.c.bf16 %v1054_v8, %v1053_v20  ;;  %v1052_v9 = vmax.f32 %v848_v0, 0.0  ;;  %v3433_v18 = vpack.c.bf16 %v1090_v55, %v1089_v62  ;;  %v1088_v47 = vmax.f32 %v992_v34, 0.0 }
 0x105   :  { %v2601_v29 = vpop.f32.mrb[20].mxu0  ;;  %v3435_v33 = vpack.c.bf16 %v1082_v32, %v1081_v35  ;;  %v2637_v39 = vpop.f32.mrb[20].mxu1 }
 0x106   :  { %v1107_v5 = vpack.c.bf16 %v1052_v9, %v1051_v15  ;;  %v869_v42 = vadd.f32 %v2601_v29, %v3301_v23  ;;  %v860_v44 = vpop.f32.mrb[21].mxu0  ;;  %v3438_v59 = vpack.c.bf16 %v1088_v47, %v1087_v48  ;;  %v1013_v16 = vadd.f32 %v2637_v39, %v3354_v1  ;;  %v1004_v10 = vpop.f32.mrb[21].mxu1 }
 0x107   :  { %v2602_v36 = vpop.f32.mrb[22].mxu0  ;;  %v861_v61 = vadd.f32 %v860_v44, %v3260_v6  ;;  %v2638_v37 = vpop.f32.mrb[22].mxu1  ;;  %v1005_v11 = vadd.f32 %v1004_v10, %v3342_v49 }
 0x108   :  { %v872_v26 = vadd.f32 %v2602_v36, %v3303_v24  ;;  %2331 = vmatprep.subr.bf16.mxu1 %v1107_v5  ;;  %v1016_v54 = vadd.f32 %v2638_v37, %v3356_v4  ;;  %v863_v28 = vpop.f32.mrb[23].mxu0  ;;  %v1057_v23 = vmax.f32 %v869_v42, 0.0  ;;  %v1007_v1 = vpop.f32.mrb[23].mxu1  ;;  %v1093_v8 = vmax.f32 %v1013_v16, 0.0 }
 0x109   :  { %2332 = vmatpush3.bf16.msra.mxu1 %v3371_v17  ;;  %v864_v20 = vadd.f32 %v863_v28, %v3262_v7  ;;  %v1008_v6 = vadd.f32 %v1007_v1, %v3344_v52  ;;  %v1055_v24 = vmax.f32 %v861_v61, 0.0  ;;  %v1091_v62 = vmax.f32 %v1005_v11, 0.0 }
 0x10a   :  { %v1058_v43 = vmax.f32 %v872_v26, 0.0  ;;  %2333 = vmatprep.subr.bf16.mxu1 %v1108_v63  ;;  %v1094_v31 = vmax.f32 %v1016_v54, 0.0 }
 0x10b   :  { %v1056_v38 = vmax.f32 %v864_v20, 0.0  ;;  %v1092_v4 = vmax.f32 %v1008_v6, 0.0 }
 0x10c   :  { %v1110_v0 = vpack.c.bf16 %v1058_v43, %v1057_v23  ;;  %v3448_v49 = vpack.c.bf16 %v1094_v31, %v1093_v8 }
 0x10d   :  { %2334 = vmatpush3.bf16.msra.mxu1 %v3363_v3  ;;  %v2605_v17 = vpop.f32.mrb[24].mxu0  ;;  %v1109_v55 = vpack.c.bf16 %v1056_v38, %v1055_v24  ;;  %v2641_v7 = vpop.f32.mrb[24].mxu1  ;;  %v3452_v15 = vpack.c.bf16 %v1092_v4, %v1091_v62  ;;  %v3893_v62 = vld [vmem:[#allocation6_spill] sm:$0xff] }
 0x10e   :  { %v885_v35 = vadd.f32 %v2605_v17, %v3346_v57  ;;  %v876_v34 = vpop.f32.mrb[25].mxu0  ;;  %v1029_v63 = vadd.f32 %v2641_v7, %v3413_v12  ;;  %v1020_v52 = vpop.f32.mrb[25].mxu1 }
 0x10f   :  { %v2606_v32 = vpop.f32.mrb[26].mxu0  ;;  %v877_v9 = vadd.f32 %v876_v34, %v3331_v40  ;;  %v2642_v47 = vpop.f32.mrb[26].mxu1  ;;  %2335 = vmatprep.subr.bf16.mxu1 %v1109_v55  ;;  %v1021_v3 = vadd.f32 %v1020_v52, %v3381_v22  ;;  %v2688_v34 = vld [vmem:[%s3880_s3 + $0x24] ss:$16 sps:$4 sm:$0xff]  }
 0x110   :  { %v888_v48 = vadd.f32 %v2606_v32, %v3348_v60  ;;  %v1032_v29 = vadd.f32 %v2642_v47, %v3417_v21  ;;  %v879_v5 = vpop.f32.mrb[27].mxu0  ;;  %v1061_v57 = vmax.f32 %v885_v35, 0.0  ;;  %v1023_v12 = vpop.f32.mrb[27].mxu1  ;;  %v1097_v44 = vmax.f32 %v1029_v63, 0.0  ;;  %v3894_v63 = vld [vmem:[#allocation9_spill] sm:$0xff]  ;;  %v3895_v52 = vld [vmem:[#allocation8_spill] sm:$0xff] }
 0x111   :  { %2336 = vmatpush3.bf16.msra.mxu1 %v3387_v25  ;;  %v880_v39 = vadd.f32 %v879_v5, %v3333_v41  ;;  %v1024_v40 = vadd.f32 %v1023_v12, %v3385_v30  ;;  %v1059_v60 = vmax.f32 %v877_v9, 0.0  ;;  %v1095_v61 = vmax.f32 %v1021_v3, 0.0  ;;  %v3896_v32 = vld [vmem:[#allocation11_spill] sm:$0xff]  ;;  %v2700_v9 = vld [vmem:[%s3880_s3 + $0x84] ss:$16 sps:$4 sm:$0xff]  }
 0x112   :  { %v1062_v42 = vmax.f32 %v888_v48, 0.0  ;;  %2337 = vmatprep.subr.bf16.mxu1 %v1110_v0  ;;  %v1098_v16 = vmax.f32 %v1032_v29, 0.0  ;;  %v3898_v48 = vld [vmem:[#allocation12_spill] sm:$0xff]  ;;  %v2703_v47 = vld [vmem:[%s3880_s3 + $0x2c] ss:$16 sps:$4 sm:$0xff]  }
 0x113   :  { %v1060_v36 = vmax.f32 %v880_v39, 0.0  ;;  %v1096_v21 = vmax.f32 %v1024_v40, 0.0  ;;  %v2702_v3 = vld [vmem:[%s3880_s3 + $0x80] ss:$16 sps:$4 sm:$0xff]   ;;  %v2705_v29 = vld [vmem:[%s3880_s3 + $0xa4] ss:$16 sps:$4 sm:$0xff]  }
 0x114   :  { %v1112_v10 = vpack.c.bf16 %v1062_v42, %v1061_v57  ;;  %v3462_v22 = vpack.c.bf16 %v1098_v16, %v1097_v44  ;;  %v2709_v5 = vld [vmem:[%s3880_s3 + $0x4c] ss:$16 sps:$4 sm:$0xff]   ;;  %v2708_v57 = vld [vmem:[%s3880_s3 + $0xa0] ss:$16 sps:$4 sm:$0xff]   ;;  %v2711_v42 = vld [vmem:[%s3880_s3 + $0xc4] ss:$16 sps:$4 sm:$0xff]  }
 0x115   :  { %2338 = vmatpush3.bf16.msra.mxu1 %v3379_v13  ;;  %v2609_v25 = vpop.f32.mrb[28].mxu0  ;;  %v1111_v26 = vpack.c.bf16 %v1060_v36, %v1059_v60  ;;  %v1129_v11 = vpack.c.bf16 %v1096_v21, %v1095_v61  ;;  %v2713_v39 = vld [vmem:[%s3880_s3 + $0x48] ss:$16 sps:$4 sm:$0xff]   ;;  %v2715_v12 = vld [vmem:[%s3880_s3 + $0x6c] ss:$16 sps:$4 sm:$0xff]  }
 0x116   :  { %v901_v37 = vadd.f32 %v2609_v25, %v3401_v45  ;;  %v892_v41 = vpop.f32.mrb[29].mxu0  ;;  %v2714_v44 = vld [vmem:[%s3880_s3 + $0xc0] ss:$16 sps:$4 sm:$0xff]   ;;  %v2717_v16 = vld [vmem:[%s3880_s3 + $0xe4] ss:$16 sps:$4 sm:$0xff]  }
 0x117   :  { %v893_v54 = vadd.f32 %v892_v41, %v3365_v19  ;;  %v2610_v28 = vpop.f32.mrb[30].mxu0  ;;  %2339 = vmatprep.subr.bf16.mxu1 %v1111_v26  ;;  %v2719_v40 = vld [vmem:[%s3880_s3 + $0x68] ss:$16 sps:$4 sm:$0xff]   ;;  %v2721_v60 = vld [vmem:[%s3880_s3 + $0x8c] ss:$16 sps:$4 sm:$0xff]  }
 0x118   :  { %v904_v30 = vadd.f32 %v2610_v28, %v3403_v56  ;;  %v895_v23 = vpop.f32.mrb[31].mxu0  ;;  %v1065_v20 = vmax.f32 %v901_v37, 0.0  ;;  %v2723_v36 = vld [vmem:[%s3880_s3 + $0x104] ss:$16 sps:$4 sm:$0xff]   ;;  %v2725_v61 = vld [vmem:[%s3880_s3 + $0x88] ss:$16 sps:$4 sm:$0xff]  }
 0x119   :  { %v896_v43 = vadd.f32 %v895_v23, %v3369_v14  ;;  %2340 = vmatpush3.bf16.msra.mxu1 %v3405_v51  ;;  %v1063_v13 = vmax.f32 %v893_v54, 0.0  ;;  %v3892_v14 = vld [vmem:[#allocation7_spill] sm:$0xff]  ;;  %v2729_v25 = vld [vmem:[%s3880_s3 + $0x124] ss:$16 sps:$4 sm:$0xff]  }
 0x11a   :  { %v1066_v1 = vmax.f32 %v904_v30, 0.0  ;;  %2341 = vmatprep.subr.bf16.mxu1 %v1112_v10  ;;  %v2720_v10 = vld [vmem:[%s3880_s3 + $0xe0] ss:$16 sps:$4 sm:$0xff]   ;;  %v2731_v26 = vld [vmem:[%s3880_s3 + $0xa8] ss:$16 sps:$4 sm:$0xff]  }
 0x11b   :  { %v1064_v8 = vmax.f32 %v896_v43, 0.0  ;;  %v2726_v21 = vld [vmem:[%s3880_s3 + $0x100] ss:$16 sps:$4 sm:$0xff]   ;;  %v2733_v37 = vld [vmem:[%s3880_s3 + $0xcc] ss:$16 sps:$4 sm:$0xff]  }
 0x11c   :  { %v1114_v31 = vpack.c.bf16 %v1066_v1, %v1065_v20  ;;  %v2732_v41 = vld [vmem:[%s3880_s3 + $0x120] ss:$16 sps:$4 sm:$0xff]   ;;  %v2737_v54 = vld [vmem:[%s3880_s3 + $0xc8] ss:$16 sps:$4 sm:$0xff]   ;;  %v2739_v28 = vld [vmem:[%s3880_s3 + $0xec] ss:$16 sps:$4 sm:$0xff]  }
 0x11d   :  { %v1113_v45 = vpack.c.bf16 %v1064_v8, %v1063_v13  ;;  %2342 = vmatpush3.bf16.msra.mxu1 %v3399_v53  ;;  %v2613_v6 = vpop.f32.mrb[32].mxu0  ;;  %v2738_v30 = vld [vmem:[%s3880_s3 + $0x140] ss:$16 sps:$4 sm:$0xff]   ;;  %v2741_v23 = vld [vmem:[%s3880_s3 + $0x164] ss:$16 sps:$4 sm:$0xff]  }
 0x11e   :  { %v917_v19 = vadd.f32 %v2613_v6, %v3250_v2  ;;  %v908_v24 = vpop.f32.mrb[33].mxu0  ;;  %v2685_v2 = vld [vmem:[%s3880_s3] ss:$16 sps:$4 sm:$0xff]   ;;  %v2743_v43 = vld [vmem:[%s3880_s3 + $0xe8] ss:$16 sps:$4 sm:$0xff]  }
 0x11f   :  { %v909_v56 = vadd.f32 %v908_v24, %v3210_v50  ;;  %v2614_v0 = vpop.f32.mrb[34].mxu0  ;;  %2343 = vmatprep.subr.bf16.mxu1 %v1113_v45  ;;  %v2745_v20 = vld [vmem:[%s3880_s3 + $0x10c] ss:$16 sps:$4 sm:$0xff]   ;;  %v2744_v1 = vld [vmem:[%s3880_s3 + $0x160] ss:$16 sps:$4 sm:$0xff]  }
 0x120   :  { %v920_v38 = vadd.f32 %v2614_v0, %v3892_v14  ;;  %v911_v51 = vpop.f32.mrb[35].mxu0  ;;  %v1069_v17 = vmax.f32 %v917_v19, 0.0  ;;  %v2747_v13 = vld [vmem:[%s3880_s3 + $0x184] ss:$16 sps:$4 sm:$0xff]   ;;  %v2749_v8 = vld [vmem:[%s3880_s3 + $0x108] ss:$16 sps:$4 sm:$0xff]  }
 0x121   :  { %v912_v4 = vadd.f32 %v911_v51, %v3893_v62  ;;  %2344 = vmatpush3.bf16.msra.mxu1 %v3421_v58  ;;  %v1067_v35 = vmax.f32 %v909_v56, 0.0  ;;  %v2690_v58 = vld [vmem:[%s3880_s3 + $0x20] ss:$16 sps:$4 sm:$0xff]   ;;  %v2753_v6 = vld [vmem:[%s3880_s3 + $0x1a4] ss:$16 sps:$4 sm:$0xff]  }
 0x122   :  { %v1070_v55 = vmax.f32 %v920_v38, 0.0  ;;  %2345 = vmatprep.subr.bf16.mxu1 %v1114_v31  ;;  %v2751_v31 = vld [vmem:[%s3880_s3 + $0x12c] ss:$16 sps:$4 sm:$0xff]   ;;  %v2750_v45 = vld [vmem:[%s3880_s3 + $0x180] ss:$16 sps:$4 sm:$0xff]  }
 0x123   :  { %v1068_v53 = vmax.f32 %v912_v4, 0.0  ;;  %v2755_v19 = vld [vmem:[%s3880_s3 + $0x128] ss:$16 sps:$4 sm:$0xff]   ;;  %v2757_v24 = vld [vmem:[%s3880_s3 + $0x14c] ss:$16 sps:$4 sm:$0xff]  }
 0x124   :  { %v1116_v7 = vpack.c.bf16 %v1070_v55, %v1069_v17  ;;  %v2756_v56 = vld [vmem:[%s3880_s3 + $0x1a0] ss:$16 sps:$4 sm:$0xff]   ;;  %v2759_v0 = vld [vmem:[%s3880_s3 + $0x1c4] ss:$16 sps:$4 sm:$0xff]   ;;  %v2761_v14 = vld [vmem:[%s3880_s3 + $0x148] ss:$16 sps:$4 sm:$0xff]  }
 0x125   :  { %v1115_v50 = vpack.c.bf16 %v1068_v53, %v1067_v35  ;;  %2346 = vmatpush3.bf16.msra.mxu1 %v3419_v27  ;;  %v2691_v27 = vld [vmem:[%s3880_s3 + $0x44] ss:$16 sps:$4 sm:$0xff]   ;;  %v2763_v38 = vld [vmem:[%s3880_s3 + $0x16c] ss:$16 sps:$4 sm:$0xff]   ;;  %v2762_v51 = vld [vmem:[%s3880_s3 + $0x1c0] ss:$16 sps:$4 sm:$0xff]  }
 0x126   :  { %v2765_v62 = vld [vmem:[%s3880_s3 + $0x1e4] ss:$16 sps:$4 sm:$0xff]   ;;  %v2767_v4 = vld [vmem:[%s3880_s3 + $0x168] ss:$16 sps:$4 sm:$0xff]   ;;  %v2769_v17 = vld [vmem:[%s3880_s3 + $0x18c] ss:$16 sps:$4 sm:$0xff]  }
 0x127   :  { %2444 = vmatpush3.bf16.msra.mxu0 %v1115_v50  ;;  %v2768_v55 = vld [vmem:[%s3880_s3 + $0x1e0] ss:$16 sps:$4 sm:$0xff]   ;;  %v2771_v35 = vld [vmem:[%s3880_s3 + $0x188] ss:$16 sps:$4 sm:$0xff]   ;;  %v2772_v53 = vld [vmem:[%s3880_s3 + $0x1ac] ss:$16 sps:$4 sm:$0xff]  }
 0x128   :  { %1740 = vmatmul.mubr.bf16.vlgmr.msra.gmra.mrb[28].mxu1 %v2685_v2  ;;  %2445 = vmatprep.subr.bf16.mxu0 %v3415_v46  ;;  %v2693_v46 = vld [vmem:[%s3880_s3 + $0x40] ss:$16 sps:$4 sm:$0xff]   ;;  %v2775_v2 = vld [vmem:[%s3880_s3 + $0x1cc] ss:$16 sps:$4 sm:$0xff]   ;;  %v2777_v50 = vld [vmem:[%s3880_s3 + $0x1c8] ss:$16 sps:$4 sm:$0xff]  }
 0x129   :  { %1747 = vmatprep.mubr.bf16.mxu1 %v2688_v34  ;;  %v2778_v34 = vld [vmem:[%s3880_s3 + $0x1ec] ss:$16 sps:$4 sm:$0xff]  }
 0x12b   :  { %2446 = vmatpush3.bf16.msra.mxu0 %v1116_v7  ;;  %v2774_v7 = vld [vmem:[%s3880_s3 + $0x1a8] ss:$16 sps:$4 sm:$0xff]  }
 0x12c   :  { %2447 = vmatprep.subr.bf16.mxu0 %v3438_v59  ;;  %v2694_v59 = vld [vmem:[%s3880_s3 + $0x64] ss:$16 sps:$4 sm:$0xff]  }
 0x12f   :  { %2448 = vmatpush3.bf16.msra.mxu0 %v3894_v63  ;;  %v3677_v63 = vpop.permute.xlu1 %1314 }
 0x130   :  { %1748 = vmatmul.mubr.bf16.gmra.mrb[32].mxu1 %v2690_v58  ;;  %2449 = vmatprep.subr.bf16.mxu0 %v3433_v18  ;;  %v3897_v18 = vld [vmem:[#allocation10_spill] sm:$0xff] }
 0x131   :  { %1755 = vmatprep.mubr.bf16.mxu1 %v2691_v27  ;;  %v2780_v58 = vld [vmem:[%s3880_s3 + $0x1e8] ss:$16 sps:$4 sm:$0xff]   ;;  %v3675_v27 = vpop.permute.xlu0 %1309 }
 0x133   :  { %2450 = vmatpush3.bf16.msra.mxu0 %v3895_v52 }
 0x134   :  { %2451 = vmatprep.subr.bf16.mxu0 %v3452_v15  ;;  %v2696_v15 = vld [vmem:[%s3880_s3 + $0x60] ss:$16 sps:$4 sm:$0xff]  }
 0x135   :  { %v1230_v52 = vpop.permute.xlu0 %1229 }
 0x137   :  { %2452 = vmatpush3.bf16.msra.mxu0 %v3896_v32 }
 0x138   :  { %1756 = vmatmul.mubr.bf16.gmra.mrb[36].mxu1 %v2693_v46  ;;  %2453 = vmatprep.subr.bf16.mxu0 %v3448_v49  ;;  %v2697_v49 = vld [vmem:[%s3880_s3 + $0x8] ss:$16 sps:$4 sm:$0xff]   ;;  %v1235_v46 = vpop.permute.xlu1 %1234 }
 0x139   :  { %1763 = vmatprep.mubr.bf16.mxu1 %v2694_v59  ;;  %v3679_v59 = vpop.permute.xlu0 %1319 }
 0x13b   :  { %2454 = vmatpush3.bf16.msra.mxu0 %v3897_v18 }
 0x13c   :  { %2455 = vmatprep.subr.bf16.mxu0 %v1129_v11  ;;  %v2735_v11 = vld [vmem:[%s3880_s3 + $0x144] ss:$16 sps:$4 sm:$0xff]   ;;  %v3681_v32 = vpop.permute.xlu1 %1324 }
 0x13d   :  { %v3683_v18 = vpop.permute.xlu0 %1239 }
 0x13f   :  { %2456 = vmatpush3.bf16.msra.mxu0 %v3898_v48 }
 0x140   :  { %1764 = vmatmul.mubr.bf16.gmra.mrb[40].mxu1 %v2696_v15  ;;  %2457 = vmatprep.subr.bf16.mxu0 %v3462_v22  ;;  %v2727_v22 = vld [vmem:[%s3880_s3 + $0xac] ss:$16 sps:$4 sm:$0xff]  }
 0x141   :  { %1771 = vmatprep.mubr.bf16.mxu1 %v2700_v9  ;;  %v3685_v9 = vpop.permute.xlu1 %1244 }
 0x143   :  { %2458 = vmatpush3.bf16.msra.mxu0 %v3435_v33  ;;  %v2707_v33 = vld [vmem:[%s3880_s3 + $0x28] ss:$16 sps:$4 sm:$0xff]  }
 0x146   :  { %1901 = vmatmul.mubr.bf16.vlgmr.msra.gmra.mrb[36].mxu0 %v2697_v49 }
 0x147   :  { %1908 = vmatprep.mubr.bf16.mxu0 %v2703_v47 }
 0x148   :  { %1772 = vmatmul.mubr.bf16.gmra.mrb[44].mxu1 %v2702_v3 }
 0x149   :  { %1779 = vmatprep.mubr.bf16.mxu1 %v2705_v29 }
 0x14e   :  { %1909 = vmatmul.mubr.bf16.gmra.mrb[40].mxu0 %v2707_v33  ;;  %v3687_v33 = vpop.permute.xlu0 %1329 }
 0x14f   :  { %1916 = vmatprep.mubr.bf16.mxu0 %v2709_v5  ;;  %v3689_v5 = vpop.permute.xlu1 %1334 }
 0x150   :  { %1780 = vmatmul.mubr.bf16.gmra.mrb[48].mxu1 %v2708_v57 }
 0x151   :  { %1787 = vmatprep.mubr.bf16.mxu1 %v2711_v42 }
 0x156   :  { %1917 = vmatmul.mubr.bf16.gmra.mrb[44].mxu0 %v2713_v39 }
 0x157   :  { %1924 = vmatprep.mubr.bf16.mxu0 %v2715_v12 }
 0x158   :  { %1788 = vmatmul.mubr.bf16.gmra.mrb[52].mxu1 %v2714_v44 }
 0x159   :  { %1795 = vmatprep.mubr.bf16.mxu1 %v2717_v16  ;;  %v3691_v16 = vpop.permute.xlu0 %1249 }
 0x15e   :  { %1925 = vmatmul.mubr.bf16.gmra.mrb[48].mxu0 %v2719_v40 }
 0x15f   :  { %1932 = vmatprep.mubr.bf16.mxu0 %v2721_v60  ;;  %v3693_v60 = vpop.permute.xlu1 %1254 }
 0x160   :  { %1796 = vmatmul.mubr.bf16.gmra.mrb[56].mxu1 %v2720_v10 }
 0x161   :  { %1803 = vmatprep.mubr.bf16.mxu1 %v2723_v36 }
 0x166   :  { %1933 = vmatmul.mubr.bf16.gmra.mrb[52].mxu0 %v2725_v61  ;;  %v3695_v61 = vpop.permute.xlu0 %1339 }
 0x167   :  { %1940 = vmatprep.mubr.bf16.mxu0 %v2727_v22 }
 0x168   :  { %1804 = vmatmul.mubr.bf16.gmra.mrb[60].mxu1 %v2726_v21 }
 0x169   :  { %1811 = vmatprep.mubr.bf16.mxu1 %v2729_v25  ;;  %v3699_v25 = vpop.permute.xlu1 %1344 }
 0x16e   :  { %1941 = vmatmul.mubr.bf16.gmra.mrb[56].mxu0 %v2731_v26 }
 0x16f   :  { %1948 = vmatprep.mubr.bf16.mxu0 %v2733_v37 }
 0x170   :  { %1812 = vmatmul.mubr.bf16.gmra.mrb[64].mxu1 %v2732_v41  ;;  %v3703_v41 = vpop.permute.xlu0 %1259 }
 0x171   :  { %1819 = vmatprep.mubr.bf16.mxu1 %v2735_v11 }
 0x176   :  { %1949 = vmatmul.mubr.bf16.gmra.mrb[60].mxu0 %v2737_v54  ;;  %v3705_v54 = vpop.permute.xlu1 %1264 }
 0x177   :  { %1956 = vmatprep.mubr.bf16.mxu0 %v2739_v28 }
 0x178   :  { %1820 = vmatmul.mubr.bf16.gmra.mrb[68].mxu1 %v2738_v30 }
 0x179   :  { %1827 = vmatprep.mubr.bf16.mxu1 %v2741_v23 }
 0x17e   :  { %1957 = vmatmul.mubr.bf16.gmra.mrb[64].mxu0 %v2743_v43 }
 0x17f   :  { %1964 = vmatprep.mubr.bf16.mxu0 %v2745_v20 }
 0x180   :  { %1828 = vmatmul.mubr.bf16.gmra.mrb[72].mxu1 %v2744_v1  ;;  %v2084_v1 = vlaneseq }
 0x181   :  { %1835 = vmatprep.mubr.bf16.mxu1 %v2747_v13  ;;  %v3711_v13 = vpop.permute.xlu0 %1349 }
 0x186   :  { %1965 = vmatmul.mubr.bf16.gmra.mrb[68].mxu0 %v2749_v8 }
 0x187   :  { %1972 = vmatprep.mubr.bf16.mxu0 %v2751_v31  ;;  %v3713_v31 = vpop.permute.xlu1 %1354 }
 0x188   :  { %1836 = vmatmul.mubr.bf16.gmra.mrb[76].mxu1 %v2750_v45 }
 0x189   :  { %1843 = vmatprep.mubr.bf16.mxu1 %v2753_v6  ;;  %v2806_v6 = vmov 1966171168  }
 0x18e   :  { %1973 = vmatmul.mubr.bf16.gmra.mrb[72].mxu0 %v2755_v19  ;;  %v2098_v19 = vunpack.c.l.s4 %v2806_v6 }
 0x18f   :  { %1980 = vmatprep.mubr.bf16.mxu0 %v2757_v24 }
 0x190   :  { %1844 = vmatmul.mubr.bf16.gmra.mrb[80].mxu1 %v2756_v56 }
 0x191   :  { %1851 = vmatprep.mubr.bf16.mxu1 %v2759_v0 }
 0x196   :  { %1981 = vmatmul.mubr.bf16.gmra.mrb[76].mxu0 %v2761_v14 }
 0x197   :  { %1988 = vmatprep.mubr.bf16.mxu0 %v2763_v38  ;;  %v3715_v38 = vshrl.u32 %v2084_v1, 7 }
 0x198   :  { %1852 = vmatmul.mubr.bf16.gmra.mrb[84].mxu1 %v2762_v51 }
 0x199   :  { %1859 = vmatprep.mubr.bf16.mxu1 %v2765_v62 }
 0x19e   :  { %1989 = vmatmul.mubr.bf16.gmra.mrb[80].mxu0 %v2767_v4  ;;  %v2099_v4 = vunpack.c.0.s8 %v2098_v19 }
 0x19f   :  { %1996 = vmatprep.mubr.bf16.mxu0 %v2769_v17 }
 0x1a0   :  { %1860 = vmatmul.mubr.bf16.gmra.mrb[88].mxu1 %v2768_v55 }
 0x1a6   :  { %1997 = vmatmul.mubr.bf16.gmra.mrb[84].mxu0 %v2771_v35 }
 0x1a7   :  { %2004 = vmatprep.mubr.bf16.mxu0 %v2772_v53 }
 0x1ae   :  { %2005 = vmatmul.mubr.bf16.gmra.mrb[88].mxu0 %v2774_v7 }
 0x1af   :  { %2012 = vmatprep.mubr.bf16.mxu0 %v2775_v2  ;;  %v3722_v2 = vld.sshfl [vmem:[%s3882_s5] sm:$0x11 pattern:$0x75316420]  ;;  %s2807_s5 = smov [#allocation3]  }
 0x1b0   :  { %s2160_s17 = sshll.u32 %s2807_s5, 4  ;;  %s2161_s17 = int_to_ptr.vmem [resolvable:$true] %s2160_s17 }
 0x1b1   :  { %s2781_s18 = scalar_lea.vmem %s2161_s17, 16  ;;  %s2785_s19 = scalar_lea.vmem %s2161_s17, 32 }
 0x1b2   :  { %p2782_p0 = scmp.ne.s32.totalorder %s2161_s17, %s2781_s18  ;;  %p2786_p1 = scmp.lt.s32.totalorder %s2161_s17, %s2161_s17 }
 0x1b3   :  { %p2787_p2 = scmp.lt.s32.totalorder %s2785_s19, %s2781_s18 }
 0x1b5   :  { %p2788_p3 = por %p2787_p2, %p2786_p1 }
 0x1b6   :  { %2013 = vmatmul.mubr.bf16.gmra.mrb[92].mxu0 %v2777_v50 }
 0x1b7   :  { %2020 = vmatprep.mubr.bf16.mxu0 %v2778_v34  ;;  %v2096_v34 = vcombine.high %v3722_v2, %v3722_v2  ;;  %p2789_p4 = pnand %p2788_p3, %p2782_p0 }
 0x1be   :  { %2021 = vmatmul.mubr.bf16.gmra.mrb[96].mxu0 %v2780_v58  ;;  %v3727_v58 = vsub.s32 %v2099_v4, %v3715_v38 }
 0x1fb   :  { %v2347_v15 = vpop.f32.mrb[28].mxu1 }
 0x1fc   :  { %v2348_v48 = vpop.f32.mrb[29].mxu1 }
 0x1fd   :  { %v2349_v49 = vadd.f32 %v2348_v48, %v2347_v15  ;;  %v2350_v47 = vpop.f32.mrb[30].mxu1  ;;  %v2110_v48 = vrot.slane %v2096_v34, %v3727_v58 }
 0x1fe   :  { %v2351_v3 = vpop.f32.mrb[31].mxu1 }
 0x1ff   :  { %v2352_v29 = vadd.f32 %v2351_v3, %v2350_v47  ;;  %v1742_v24 = vadd.f32 %v2349_v49, %v1230_v52  ;;  %v3734_v49 = vpop.permute.xlu0 %1269  ;;  %2145 = vmatprep.mubr.bf16.mxu1 %v2110_v48 }
 0x201   :  { %v1745_v17 = vadd.f32 %v2352_v29, %v1235_v46  ;;  %v2103_v46 = vrot.slane %v3722_v2, %v3727_v58 }
 0x203   :  { %v2353_v57 = vpop.f32.mrb[32].mxu1 }
 0x204   :  { %v2354_v42 = vpop.f32.mrb[33].mxu1 }
 0x205   :  { %v2355_v39 = vadd.f32 %v2354_v42, %v2353_v57  ;;  %v2356_v12 = vpop.f32.mrb[34].mxu1  ;;  %v3736_v57 = vpop.permute.xlu1 %1274 }
 0x206   :  { %v2357_v44 = vpop.f32.mrb[35].mxu1 }
 0x207   :  { %v2358_v40 = vadd.f32 %v2357_v44, %v2356_v12  ;;  %v1750_v12 = vadd.f32 %v2355_v39, %v3683_v18 }
 0x20b   :  { %v2359_v10 = vpop.f32.mrb[36].mxu1 }
 0x20c   :  { %v2360_v36 = vpop.f32.mrb[37].mxu1 }
 0x20d   :  { %v3697_v22 = vadd.f32 %v2360_v36, %v2359_v10  ;;  %v2362_v21 = vpop.f32.mrb[38].mxu1 }
 0x20e   :  { %v2363_v26 = vpop.f32.mrb[39].mxu1 }
 0x20f   :  { %v3701_v37 = vadd.f32 %v2363_v26, %v2362_v21 }
 0x213   :  { %v2365_v11 = vpop.f32.mrb[40].mxu1 }
 0x214   :  { %v2366_v28 = vpop.f32.mrb[41].mxu1 }
 0x215   :  { %v3707_v30 = vadd.f32 %v2366_v28, %v2365_v11  ;;  %v2368_v23 = vpop.f32.mrb[42].mxu1  ;;  %v1753_v28 = vadd.f32 %v2358_v40, %v3685_v9  ;;  %v1758_v9 = vadd.f32 %v3697_v22, %v3691_v16 }
 0x216   :  { %v2369_v43 = vpop.f32.mrb[43].mxu1 }
 0x217   :  { %v3709_v20 = vadd.f32 %v2369_v43, %v2368_v23 }
 0x219   :  { %v2459_v8 = vpop.f32.mrb[36].mxu0 }
 0x21a   :  { %v2460_v45 = vpop.f32.mrb[37].mxu0 }
 0x21b   :  { %v2371_v56 = vpop.f32.mrb[44].mxu1  ;;  %v2461_v0 = vadd.f32 %v2460_v45, %v2459_v8  ;;  %v2462_v14 = vpop.f32.mrb[38].mxu0 }
 0x21c   :  { %v2372_v51 = vpop.f32.mrb[45].mxu1  ;;  %v2463_v62 = vpop.f32.mrb[39].mxu0 }
 0x21d   :  { %v1903_v55 = vadd.f32 %v2461_v0, %v1742_v24  ;;  %v3717_v35 = vadd.f32 %v2372_v51, %v2371_v56  ;;  %v2374_v53 = vpop.f32.mrb[46].mxu1  ;;  %v2464_v7 = vadd.f32 %v2463_v62, %v2462_v14  ;;  %v3746_v24 = vpop.permute.xlu0 %1359 }
 0x21e   :  { %v2375_v50 = vpop.f32.mrb[47].mxu1  ;;  %v3748_v0 = vpop.permute.xlu1 %1364 }
 0x21f   :  { %v1906_v52 = vadd.f32 %v2464_v7, %v1745_v17  ;;  %v3729_v15 = vadd.f32 %v2375_v50, %v2374_v53  ;;  %v2029_v47 = vmax.f32 %v1903_v55, 0.0  ;;  %v1761_v53 = vadd.f32 %v3701_v37, %v3693_v60 }
 0x221   :  { %v2030_v3 = vmax.f32 %v1906_v52, 0.0  ;;  %v2465_v29 = vpop.f32.mrb[40].mxu0  ;;  %v1280_v16 = vpop.permute.xlu0 %1279 }
 0x222   :  { %v2466_v42 = vpop.f32.mrb[41].mxu0 }
 0x223   :  { %v3739_v44 = vpack.c.bf16 %v2030_v3, %v2029_v47  ;;  %v2377_v10 = vpop.f32.mrb[48].mxu1  ;;  %v2467_v36 = vadd.f32 %v2466_v42, %v2465_v29  ;;  %v2468_v21 = vpop.f32.mrb[42].mxu0 }
 0x224   :  { %v2378_v26 = vpop.f32.mrb[49].mxu1  ;;  %v2469_v11 = vpop.f32.mrb[43].mxu0 }
 0x225   :  { %v1911_v23 = vadd.f32 %v2467_v36, %v1750_v12  ;;  %v3742_v43 = vadd.f32 %v2378_v26, %v2377_v10  ;;  %v2380_v1 = vpop.f32.mrb[50].mxu1  ;;  %v2470_v8 = vadd.f32 %v2469_v11, %v2468_v21  ;;  %v1285_v12 = vpop.permute.xlu1 %1284  ;;  %v1766_v36 = vadd.f32 %v3707_v30, %v3703_v41 }
 0x226   :  { %v2381_v45 = vpop.f32.mrb[51].mxu1  ;;  %v3770_v41 = vpop.permute.xlu0 %1369 }
 0x227   :  { %v1914_v6 = vadd.f32 %v2470_v8, %v1753_v28  ;;  %v3744_v19 = vadd.f32 %v2381_v45, %v2380_v1  ;;  %v2031_v18 = vmax.f32 %v1911_v23, 0.0  ;;  %v1769_v23 = vadd.f32 %v3709_v20, %v3705_v54 }
 0x228   :  { %v1774_v54 = vadd.f32 %v3717_v35, %v3734_v49 }
 0x229   :  { %v2032_v39 = vmax.f32 %v1914_v6, 0.0  ;;  %v2471_v56 = vpop.f32.mrb[44].mxu0 }
 0x22a   :  { %v2472_v14 = vpop.f32.mrb[45].mxu0  ;;  %v1290_v35 = vpop.permute.xlu0 %1289 }
 0x22b   :  { %v3752_v40 = vpack.c.bf16 %v2032_v39, %v2031_v18  ;;  %v2383_v51 = vpop.f32.mrb[52].mxu1  ;;  %v2473_v62 = vadd.f32 %v2472_v14, %v2471_v56  ;;  %v2474_v4 = vpop.f32.mrb[46].mxu0 }
 0x22c   :  { %v2384_v17 = vpop.f32.mrb[53].mxu1  ;;  %v2475_v55 = vpop.f32.mrb[47].mxu0 }
 0x22d   :  { %v1919_v7 = vadd.f32 %v2473_v62, %v1758_v9  ;;  %v3756_v50 = vadd.f32 %v2384_v17, %v2383_v51  ;;  %v2386_v34 = vpop.f32.mrb[54].mxu1  ;;  %v2476_v52 = vadd.f32 %v2475_v55, %v2474_v4  ;;  %v3772_v51 = vpop.permute.xlu1 %1374 }
 0x22e   :  { %v2387_v48 = vpop.f32.mrb[55].mxu1 }
 0x22f   :  { %v1922_v47 = vadd.f32 %v2476_v52, %v1761_v53  ;;  %v3758_v3 = vadd.f32 %v2387_v48, %v2386_v34  ;;  %v2033_v22 = vmax.f32 %v1919_v7, 0.0  ;;  %v1777_v34 = vadd.f32 %v3729_v15, %v3736_v57 }
 0x231   :  { %v2034_v29 = vmax.f32 %v1922_v47, 0.0  ;;  %v2477_v42 = vpop.f32.mrb[48].mxu0 }
 0x232   :  { %v2478_v10 = vpop.f32.mrb[49].mxu0 }
 0x233   :  { %v3762_v21 = vpack.c.bf16 %v2034_v29, %v2033_v22  ;;  %v2389_v60 = vpop.f32.mrb[56].mxu1  ;;  %v2479_v37 = vadd.f32 %v2478_v10, %v2477_v42  ;;  %v2480_v26 = vpop.f32.mrb[50].mxu0 }
 0x234   :  { %v2390_v11 = vpop.f32.mrb[57].mxu1  ;;  %v2481_v28 = vpop.f32.mrb[51].mxu0 }
 0x235   :  { %v1927_v1 = vadd.f32 %v2479_v37, %v1766_v36  ;;  %v3766_v8 = vadd.f32 %v2390_v11, %v2389_v60  ;;  %v2392_v45 = vpop.f32.mrb[58].mxu1  ;;  %v2482_v6 = vadd.f32 %v2481_v28, %v2480_v26  ;;  %v1295_v37 = vpop.permute.xlu1 %1294  ;;  %v1782_v11 = vadd.f32 %v3742_v43, %v1280_v16 }
 0x236   :  { %v2393_v18 = vpop.f32.mrb[59].mxu1 }
 0x237   :  { %v1930_v39 = vadd.f32 %v2482_v6, %v1769_v23  ;;  %v3768_v56 = vadd.f32 %v2393_v18, %v2392_v45  ;;  %v2035_v30 = vmax.f32 %v1927_v1, 0.0  ;;  %v1785_v6 = vadd.f32 %v3744_v19, %v1285_v12 }
 0x239   :  { %v2036_v14 = vmax.f32 %v1930_v39, 0.0  ;;  %v2483_v9 = vpop.f32.mrb[52].mxu0 }
 0x23a   :  { %v2484_v62 = vpop.f32.mrb[53].mxu0 }
 0x23b   :  { %v3776_v20 = vpack.c.bf16 %v2036_v14, %v2035_v30  ;;  %v2395_v4 = vpop.f32.mrb[60].mxu1  ;;  %v2485_v17 = vadd.f32 %v2484_v62, %v2483_v9  ;;  %v2486_v55 = vpop.f32.mrb[54].mxu0 }
 0x23c   :  { %v2396_v53 = vpop.f32.mrb[61].mxu1  ;;  %v2487_v7 = vpop.f32.mrb[55].mxu0 }
 0x23d   :  { %v1935_v52 = vadd.f32 %v2485_v17, %v1774_v54  ;;  %v3780_v48 = vadd.f32 %v2396_v53, %v2395_v4  ;;  %v2398_v47 = vpop.f32.mrb[62].mxu1  ;;  %v2488_v22 = vadd.f32 %v2487_v7, %v2486_v55  ;;  %v3792_v4 = vpop.permute.xlu0 %1379  ;;  %v1790_v7 = vadd.f32 %v3756_v50, %v1290_v35 }
 0x23e   :  { %v2399_v29 = vpop.f32.mrb[63].mxu1  ;;  %v3794_v55 = vpop.permute.xlu1 %1384 }
 0x23f   :  { %v1938_v42 = vadd.f32 %v2488_v22, %v1777_v34  ;;  %v3782_v10 = vadd.f32 %v2399_v29, %v2398_v47  ;;  %v2037_v49 = vmax.f32 %v1935_v52, 0.0  ;;  %v1793_v29 = vadd.f32 %v3758_v3, %v1295_v37 }
 0x241   :  { %v2038_v36 = vmax.f32 %v1938_v42, 0.0  ;;  %v2489_v60 = vpop.f32.mrb[56].mxu0 }
 0x242   :  { %v2490_v26 = vpop.f32.mrb[57].mxu0 }
 0x243   :  { %v3785_v28 = vpack.c.bf16 %v2038_v36, %v2037_v49  ;;  %v2401_v15 = vpop.f32.mrb[64].mxu1  ;;  %v2491_v57 = vadd.f32 %v2490_v26, %v2489_v60  ;;  %v2492_v23 = vpop.f32.mrb[58].mxu0 }
 0x244   :  { %v2402_v1 = vpop.f32.mrb[65].mxu1  ;;  %v2493_v45 = vpop.f32.mrb[59].mxu0 }
 0x245   :  { %v1943_v18 = vadd.f32 %v2491_v57, %v1782_v11  ;;  %v3788_v39 = vadd.f32 %v2402_v1, %v2401_v15  ;;  %v2404_v30 = vpop.f32.mrb[66].mxu1  ;;  %v2494_v14 = vadd.f32 %v2493_v45, %v2492_v23  ;;  %v1300_v57 = vpop.permute.xlu0 %1299 }
 0x246   :  { %v2405_v9 = vpop.f32.mrb[67].mxu1  ;;  %v1305_v1 = vpop.permute.xlu1 %1304 }
 0x247   :  { %v1946_v62 = vadd.f32 %v2494_v14, %v1785_v6  ;;  %v3790_v54 = vadd.f32 %v2405_v9, %v2404_v30  ;;  %v2039_v43 = vmax.f32 %v1943_v18, 0.0  ;;  %v1798_v6 = vadd.f32 %v3766_v8, %v1300_v57 }
 0x248   :  { %v1809_v57 = vadd.f32 %v3782_v10, %v3677_v63 }
 0x249   :  { %v2040_v16 = vmax.f32 %v1946_v62, 0.0  ;;  %v2495_v17 = vpop.f32.mrb[60].mxu0  ;;  %v1801_v62 = vadd.f32 %v3768_v56, %v1305_v1 }
 0x24a   :  { %v2496_v53 = vpop.f32.mrb[61].mxu0 }
 0x24b   :  { %v3797_v19 = vpack.c.bf16 %v2040_v16, %v2039_v43  ;;  %v2407_v12 = vpop.f32.mrb[68].mxu1  ;;  %v2497_v34 = vadd.f32 %v2496_v53, %v2495_v17  ;;  %v2498_v52 = vpop.f32.mrb[62].mxu0 }
 0x24c   :  { %v2408_v47 = vpop.f32.mrb[69].mxu1  ;;  %v2499_v22 = vpop.f32.mrb[63].mxu0 }
 0x24d   :  { %v1951_v42 = vadd.f32 %v2497_v34, %v1790_v7  ;;  %v3800_v49 = vadd.f32 %v2408_v47, %v2407_v12  ;;  %v2410_v36 = vpop.f32.mrb[70].mxu1  ;;  %v2500_v60 = vadd.f32 %v2499_v22, %v2498_v52 }
 0x24e   :  { %v2411_v26 = vpop.f32.mrb[71].mxu1 }
 0x24f   :  { %v1954_v11 = vadd.f32 %v2500_v60, %v1793_v29  ;;  %v3802_v15 = vadd.f32 %v2411_v26, %v2410_v36  ;;  %v2041_v50 = vmax.f32 %v1951_v42, 0.0  ;;  %v1806_v29 = vadd.f32 %v3780_v48, %v3675_v27 }
 0x251   :  { %v2042_v35 = vmax.f32 %v1954_v11, 0.0  ;;  %v2501_v23 = vpop.f32.mrb[64].mxu0 }
 0x252   :  { %v2502_v45 = vpop.f32.mrb[65].mxu0 }
 0x253   :  { %v3805_v18 = vpack.c.bf16 %v2042_v35, %v2041_v50  ;;  %v2413_v3 = vpop.f32.mrb[72].mxu1  ;;  %v2503_v37 = vadd.f32 %v2502_v45, %v2501_v23  ;;  %v2504_v30 = vpop.f32.mrb[66].mxu0 }
 0x254   :  { %v2414_v14 = vpop.f32.mrb[73].mxu1  ;;  %v2505_v9 = vpop.f32.mrb[67].mxu0 }
 0x255   :  { %v1959_v43 = vadd.f32 %v2503_v37, %v1798_v6  ;;  %v3808_v16 = vadd.f32 %v2414_v14, %v2413_v3  ;;  %v2416_v17 = vpop.f32.mrb[74].mxu1  ;;  %v2506_v53 = vadd.f32 %v2505_v9, %v2504_v30  ;;  %v1814_v14 = vadd.f32 %v3788_v39, %v3679_v59 }
 0x256   :  { %v2417_v7 = vpop.f32.mrb[75].mxu1 }
 0x257   :  { %v1962_v12 = vadd.f32 %v2506_v53, %v1801_v62  ;;  %v3810_v34 = vadd.f32 %v2417_v7, %v2416_v17  ;;  %v2043_v52 = vmax.f32 %v1959_v43, 0.0  ;;  %v1817_v53 = vadd.f32 %v3790_v54, %v3681_v32 }
 0x259   :  { %v2044_v8 = vmax.f32 %v1962_v12, 0.0  ;;  %v2507_v47 = vpop.f32.mrb[68].mxu0 }
 0x25a   :  { %v2508_v22 = vpop.f32.mrb[69].mxu0 }
 0x25b   :  { %v3814_v42 = vpack.c.bf16 %v2044_v8, %v2043_v52  ;;  %v2419_v36 = vpop.f32.mrb[76].mxu1  ;;  %v2509_v56 = vadd.f32 %v2508_v22, %v2507_v47  ;;  %v2510_v60 = vpop.f32.mrb[70].mxu0 }
 0x25c   :  { %v2420_v26 = vpop.f32.mrb[77].mxu1  ;;  %v2511_v11 = vpop.f32.mrb[71].mxu0 }
 0x25d   :  { %v1967_v50 = vadd.f32 %v2509_v56, %v1806_v29  ;;  %v3818_v35 = vadd.f32 %v2420_v26, %v2419_v36  ;;  %v2422_v23 = vpop.f32.mrb[78].mxu1  ;;  %v2512_v1 = vadd.f32 %v2511_v11, %v2510_v60  ;;  %v1822_v60 = vadd.f32 %v3800_v49, %v3687_v33 }
 0x25e   :  { %v2423_v45 = vpop.f32.mrb[79].mxu1 }
 0x25f   :  { %v1970_v6 = vadd.f32 %v2512_v1, %v1809_v57  ;;  %v3820_v3 = vadd.f32 %v2423_v45, %v2422_v23  ;;  %v2045_v27 = vmax.f32 %v1967_v50, 0.0  ;;  %v1825_v23 = vadd.f32 %v3802_v15, %v3689_v5 }
 0x261   :  { %v2046_v48 = vmax.f32 %v1970_v6, 0.0  ;;  %v2513_v37 = vpop.f32.mrb[72].mxu0 }
 0x262   :  { %v2514_v30 = vpop.f32.mrb[73].mxu0 }
 0x263   :  { %v2425_v9 = vpop.f32.mrb[80].mxu1  ;;  %v2515_v62 = vadd.f32 %v2514_v30, %v2513_v37  ;;  %v2516_v43 = vpop.f32.mrb[74].mxu0  ;;  %v2069_v63 = vpack.c.bf16 %v2046_v48, %v2045_v27 }
 0x264   :  { %v2426_v10 = vpop.f32.mrb[81].mxu1  ;;  %v2517_v17 = vpop.f32.mrb[75].mxu0 }
 0x265   :  { %v1975_v7 = vadd.f32 %v2515_v62, %v1814_v14  ;;  %v3826_v12 = vadd.f32 %v2426_v10, %v2425_v9  ;;  %v2428_v52 = vpop.f32.mrb[82].mxu1  ;;  %v2518_v8 = vadd.f32 %v2517_v17, %v2516_v43  ;;  %2555 = vmatprep.subr.bf16.mxu1 %v2069_v63  ;;  %v1830_v9 = vadd.f32 %v3808_v16, %v3695_v61 }
 0x266   :  { %v2429_v47 = vpop.f32.mrb[83].mxu1  ;;  %2556 = vmatpush3.bf16.msra.mxu1 %v3739_v44  ;;  %v1833_v17 = vadd.f32 %v3810_v34, %v3699_v25 }
 0x267   :  { %v1978_v22 = vadd.f32 %v2518_v8, %v1817_v53  ;;  %v3829_v59 = vadd.f32 %v2429_v47, %v2428_v52  ;;  %v2047_v39 = vmax.f32 %v1975_v7, 0.0 }
 0x269   :  { %v2048_v29 = vmax.f32 %v1978_v22, 0.0  ;;  %v2519_v36 = vpop.f32.mrb[76].mxu0 }
 0x26a   :  { %v2520_v56 = vpop.f32.mrb[77].mxu0 }
 0x26b   :  { %v2431_v32 = vpop.f32.mrb[84].mxu1  ;;  %v2521_v54 = vadd.f32 %v2520_v56, %v2519_v36  ;;  %v2522_v26 = vpop.f32.mrb[78].mxu0  ;;  %v2070_v11 = vpack.c.bf16 %v2048_v29, %v2047_v39  ;;  %v1838_v36 = vadd.f32 %v3818_v35, %v3711_v13  ;;  %v1846_v13 = vadd.f32 %v3826_v12, %v3746_v24 }
 0x26c   :  { %v2432_v57 = vpop.f32.mrb[85].mxu1  ;;  %v2523_v50 = vpop.f32.mrb[79].mxu0 }
 0x26d   :  { %v1983_v44 = vadd.f32 %v2521_v54, %v1822_v60  ;;  %v3835_v1 = vadd.f32 %v2432_v57, %v2431_v32  ;;  %v2434_v45 = vpop.f32.mrb[86].mxu1  ;;  %v2524_v6 = vadd.f32 %v2523_v50, %v2522_v26  ;;  %2557 = vmatprep.subr.bf16.mxu1 %v2070_v11  ;;  %v1841_v32 = vadd.f32 %v3820_v3, %v3713_v31 }
 0x26e   :  { %v2435_v27 = vpop.f32.mrb[87].mxu1  ;;  %2558 = vmatpush3.bf16.msra.mxu1 %v3752_v40  ;;  %v1849_v31 = vadd.f32 %v3829_v59, %v3748_v0 }
 0x26f   :  { %v1986_v48 = vadd.f32 %v2524_v6, %v1825_v23  ;;  %v2436_v33 = vadd.f32 %v2435_v27, %v2434_v45  ;;  %v2049_v49 = vmax.f32 %v1983_v44, 0.0  ;;  %v1854_v24 = vadd.f32 %v3835_v1, %v3770_v41 }
 0x271   :  { %v2050_v37 = vmax.f32 %v1986_v48, 0.0  ;;  %v2525_v30 = vpop.f32.mrb[80].mxu0 }
 0x272   :  { %v2526_v14 = vpop.f32.mrb[81].mxu0 }
 0x273   :  { %v2437_v62 = vpop.f32.mrb[88].mxu1  ;;  %v2527_v5 = vadd.f32 %v2526_v14, %v2525_v30  ;;  %v2528_v15 = vpop.f32.mrb[82].mxu0  ;;  %v2071_v43 = vpack.c.bf16 %v2050_v37, %v2049_v49 }
 0x274   :  { %v2438_v63 = vpop.f32.mrb[89].mxu1  ;;  %v2529_v10 = vpop.f32.mrb[83].mxu0 }
 0x275   :  { %v1991_v53 = vadd.f32 %v2527_v5, %v1830_v9  ;;  %v2439_v40 = vadd.f32 %v2438_v63, %v2437_v62  ;;  %v2440_v7 = vpop.f32.mrb[90].mxu1  ;;  %v2530_v52 = vadd.f32 %v2529_v10, %v2528_v15  ;;  %2559 = vmatprep.subr.bf16.mxu1 %v2071_v43  ;;  %v1857_v5 = vadd.f32 %v2436_v33, %v3772_v51 }
 0x276   :  { %v2441_v8 = vpop.f32.mrb[91].mxu1  ;;  %2560 = vmatpush3.bf16.msra.mxu1 %v3762_v21 }
 0x277   :  { %v1994_v47 = vadd.f32 %v2530_v52, %v1833_v17  ;;  %v2442_v22 = vadd.f32 %v2441_v8, %v2440_v7  ;;  %v2051_v61 = vmax.f32 %v1991_v53, 0.0  ;;  %v1862_v17 = vadd.f32 %v2439_v40, %v3792_v4  ;;  %v2082_v40 = vpop.permute.xlu0 %2081 }
 0x278   :  { %v2086_v4 = vsub.s32 0, %v3715_v38 }
 0x279   :  { %v2052_v16 = vmax.f32 %v1994_v47, 0.0  ;;  %v2531_v39 = vpop.f32.mrb[84].mxu0  ;;  %v1865_v52 = vadd.f32 %v2442_v22, %v3794_v55 }
 0x27a   :  { %v2532_v29 = vpop.f32.mrb[85].mxu0 }
 0x27b   :  { %v2533_v56 = vadd.f32 %v2532_v29, %v2531_v39  ;;  %v2534_v60 = vpop.f32.mrb[86].mxu0  ;;  %v2072_v25 = vpack.c.bf16 %v2052_v16, %v2051_v61  ;;  %v2087_v16 = vrot.slane %v2082_v40, %v2086_v4 }
 0x27c   :  { %v2535_v34 = vpop.f32.mrb[87].mxu0 }
 0x27d   :  { %v1999_v54 = vadd.f32 %v2533_v56, %v1838_v36  ;;  %v2536_v26 = vadd.f32 %v2535_v34, %v2534_v60  ;;  %2561 = vmatprep.subr.bf16.mxu1 %v2072_v25 }
 0x27e   :  { %2562 = vmatpush3.bf16.msra.mxu1 %v3776_v20 }
 0x27f   :  { %v2002_v21 = vadd.f32 %v2536_v26, %v1841_v32  ;;  %v2053_v11 = vmax.f32 %v1999_v54, 0.0 }
 0x281   :  { %v2054_v57 = vmax.f32 %v2002_v21, 0.0  ;;  %v2537_v50 = vpop.f32.mrb[88].mxu0 }
 0x282   :  { %v2538_v23 = vpop.f32.mrb[89].mxu0 }
 0x283   :  { %v2539_v35 = vadd.f32 %v2538_v23, %v2537_v50  ;;  %v2540_v44 = vpop.f32.mrb[90].mxu0  ;;  %v2073_v45 = vpack.c.bf16 %v2054_v57, %v2053_v11 }
 0x284   :  { %v2541_v6 = vpop.f32.mrb[91].mxu0 }
 0x285   :  { %v2007_v3 = vadd.f32 %v2539_v35, %v1846_v13  ;;  %v2542_v27 = vadd.f32 %v2541_v6, %v2540_v44  ;;  %2563 = vmatprep.subr.bf16.mxu1 %v2073_v45 }
 0x286   :  { %2564 = vmatpush3.bf16.msra.mxu1 %v3785_v28 }
 0x287   :  { %v2010_v20 = vadd.f32 %v2542_v27, %v1849_v31  ;;  %v2055_v48 = vmax.f32 %v2007_v3, 0.0 }
 0x289   :  { %v2056_v49 = vmax.f32 %v2010_v20, 0.0  ;;  %v2543_v37 = vpop.f32.mrb[92].mxu0 }
 0x28a   :  { %v2544_v30 = vpop.f32.mrb[93].mxu0 }
 0x28b   :  { %v2545_v12 = vadd.f32 %v2544_v30, %v2543_v37  ;;  %v2546_v14 = vpop.f32.mrb[94].mxu0  ;;  %v2074_v9 = vpack.c.bf16 %v2056_v49, %v2055_v48 }
 0x28c   :  { %v2547_v62 = vpop.f32.mrb[95].mxu0 }
 0x28d   :  { %v2015_v0 = vadd.f32 %v2545_v12, %v1854_v24  ;;  %v2548_v59 = vadd.f32 %v2547_v62, %v2546_v14  ;;  %2565 = vmatprep.subr.bf16.mxu1 %v2074_v9 }
 0x28e   :  { %2566 = vmatpush3.bf16.msra.mxu1 %v3797_v19 }
 0x28f   :  { %v2018_v28 = vadd.f32 %v2548_v59, %v1857_v5  ;;  %v2057_v15 = vmax.f32 %v2015_v0, 0.0 }
 0x291   :  { %v2058_v43 = vmax.f32 %v2018_v28, 0.0  ;;  %v2549_v63 = vpop.f32.mrb[96].mxu0 }
 0x292   :  { %v2550_v10 = vpop.f32.mrb[97].mxu0 }
 0x293   :  { %v2551_v53 = vadd.f32 %v2550_v10, %v2549_v63  ;;  %v2552_v41 = vpop.f32.mrb[98].mxu0  ;;  %v2075_v1 = vpack.c.bf16 %v2058_v43, %v2057_v15 }
 0x294   :  { %v2553_v7 = vpop.f32.mrb[99].mxu0 }
 0x295   :  { %v2023_v8 = vadd.f32 %v2551_v53, %v1862_v17  ;;  %v2554_v51 = vadd.f32 %v2553_v7, %v2552_v41  ;;  %2567 = vmatprep.subr.bf16.mxu1 %v2075_v1 }
 0x296   :  { %2568 = vmatpush3.bf16.msra.mxu1 %v3805_v18 }
 0x297   :  { %v2026_v33 = vadd.f32 %v2554_v51, %v1865_v52  ;;  %v2059_v19 = vmax.f32 %v2023_v8, 0.0 }
 0x299   :  { %v2060_v47 = vmax.f32 %v2026_v33, 0.0 }
 0x29b   :  { %v2076_v61 = vpack.c.bf16 %v2060_v47, %v2059_v19 }
 0x29d   :  { %2569 = vmatprep.subr.bf16.mxu1 %v2076_v61 }
 0x29e   :  { %2570 = vmatpush3.bf16.msra.mxu1 %v3814_v42 }
 0x2a1   :  { %2146 = vmatmul.mubr.bf16.vlgmr.msra.gmra.mrb[92].mxu1 %v2103_v46 }
 0x374   :  { %v2571_v55 = vpop.f32.mrb[92].mxu1 }
 0x375   :  { %v2572_v22 = vpop.f32.mrb[93].mxu1 }
 0x376   :  { %v2573_v18 = vadd.f32 %v2572_v22, %v2571_v55  ;;  %v2574_v39 = vpop.f32.mrb[94].mxu1 }
 0x377   :  { %v2575_v29 = vpop.f32.mrb[95].mxu1 }
 0x378   :  { %v2148_v36 = vadd.f32 %v2573_v18, %v2087_v16 }
 0x37a   :  { %2153 = vst [vmem:[#allocation3] sm:$0x1] %v2148_v36 }
 0x37b   :  { %2792 = shalt.err (!%p2789_p4)
}
 0x37c   :  { %s2793_s21 = scalar_lea.hbm %s3884_s7, 16 }
 0x37d   :  { %p2794_p5 = scmp.ne.s32.totalorder %s3884_s7, %s2793_s21  ;;  %p2797_p6 = scmp.lt.u32.totalorder %s2793_s21, %s3884_s7 }
 0x37f   :  { %p2799_p7 = pnand %p2797_p6, %p2794_p5 }
 0x381   :  { %2802 = shalt.err (!%p2799_p7)
}
 0x382   :  { %2163 = dma.vmem_to_hbm [thread:$0]  %s2161_s17, 16, %s3884_s7, [#allocation4]  }
 0x383   :  { %2803 = dma.done.wait [#allocation4], 16  }
 0x384   :  { %2804 = vsyncadd [#allocation4], 4294967280 }
 0x385   :  { %2167 = vsyncpa [#allocation4], 1 }

</bundles_post_ra>
